<compile_context>
chip_gen: v5e
topology: v5e:2x2
jax: 0.10.0
libtpu: 0.0.40
codegen_flags: <defaults>
</compile_context>

<pallas_src>
import math
import functools

import jax
import jax.numpy as jnp
import numpy as np
from jax.experimental import pallas as pl
from jax.experimental.pallas import tpu as pltpu


# ----------------------------------------------------------------------------
# Per-generation configuration (VMEM budget, tile targets)
# ----------------------------------------------------------------------------

def _chip_config():
    """VMEM limit + matmul tile targets gated on the TPU generation."""
    vmem_bytes = 128 * 1024 * 1024
    try:
        info = pltpu.get_tpu_info()
        for name in ("vmem_capacity_bytes", "vmem_size_bytes", "vmem_bytes"):
            v = getattr(info, name, None)
            if isinstance(v, int) and v > 0:
                vmem_bytes = v
                break
    except Exception:
        pass
    if vmem_bytes <= 64 * 1024 * 1024:
        # v7x: 64 MiB per TensorCore — keep the scoped limit and tiles modest.
        return dict(vmem_limit=48 * 1024 * 1024, tm=256, tn=512, tk=512)
    # v5e / v6e: 128 MiB — use most of it; tiles are 128/256-aligned so they
    # feed both the 128-wide (v5e) and 256-wide (v6e) MXU.
    return dict(vmem_limit=100 * 1024 * 1024, tm=512, tn=1024, tk=1024)


_CFG = _chip_config()


def _tile(dim, target, align):
    """Largest align-multiple divisor of `dim` that is <= target, else dim.

    Small dims are returned whole (full-extent block is always legal).  For
    large dims with no aligned divisor we fail loudly instead of silently
    emitting one giant, VMEM-busting block.
    """
    if dim <= target:
        return dim
    t = (min(target, dim) // align) * align
    while t >= align:
        if dim % t == 0:
            return t
        t -= align
    raise ValueError(
        f"_tile: no {align}-aligned tile divides dim={dim} "
        f"(target={target}); pad the operand to a multiple of {align}.")


# ----------------------------------------------------------------------------
# Pallas kernels
# ----------------------------------------------------------------------------

def _matmul_kernel(x_ref, w_ref, b_ref, o_ref, acc_ref, *, activation):
    """Tiled y = act(x @ W + b).  Grid = (M/tm, N/tn, K/tk), K innermost."""
    k = pl.program_id(2)

    @pl.when(k == 0)
    def _():
        acc_ref[...] = jnp.zeros_like(acc_ref)

    acc_ref[...] += jnp.dot(x_ref[...].astype(jnp.bfloat16),
                            w_ref[...].astype(jnp.bfloat16),
                            preferred_element_type=jnp.float32)

    @pl.when(k == pl.num_programs(2) - 1)
    def _():
        y = acc_ref[...] + b_ref[...]
        if activation == "gelu":  # exact erf-based gelu (BertIntermediate)
            y = 0.5 * y * (1.0 + jax.lax.erf(y * (1.0 / math.sqrt(2.0))))
        o_ref[...] = y.astype(o_ref.dtype)


def _matmul_res_ln_kernel(x_ref, w_ref, b_ref, r_ref, g_ref, bb_ref,
                          o_ref, acc_ref, *, eps):
    """Tiled y = LayerNorm(x @ W + b + residual) * gamma + beta.

    Grid = (M/tm, K/tk); the full N (= hidden) dim is kept per tile so the
    LayerNorm reduction is complete.  LN is applied on the last K step.
    """
    k = pl.program_id(1)

    @pl.when(k == 0)
    def _():
        acc_ref[...] = jnp.zeros_like(acc_ref)

    acc_ref[...] += jnp.dot(x_ref[...].astype(jnp.bfloat16),
                            w_ref[...].astype(jnp.bfloat16),
                            preferred_element_type=jnp.float32)

    @pl.when(k == pl.num_programs(1) - 1)
    def _():
        h = acc_ref[...] + b_ref[...] + r_ref[...].astype(jnp.float32)
        mu = jnp.mean(h, axis=-1, keepdims=True)
        d = h - mu
        var = jnp.mean(d * d, axis=-1, keepdims=True)
        o_ref[...] = (d * jax.lax.rsqrt(var + eps) * g_ref[...]
                      + bb_ref[...]).astype(o_ref.dtype)


def _attention_kernel(wp_ref, ep_ref, m_ref, o_ref, *,
                      word_len, ent_len, num_heads, head_dim, hidden):
    """Entity-aware attention for one batch element, all heads.

    Inputs are the fused projections
        wp = word rows    [Wl, 4H] = [q_vs_word_keys | q_vs_ent_keys | k | v]
        ep = entity rows  [El, 4H] = [q_vs_word_keys | q_vs_ent_keys | k | v]
    (the 1/sqrt(dh) score scale is folded into the query columns).  Word and
    entity query rows are attended independently (their softmax rows are
    independent) with a split online softmax — word-key and entity-key scores
    are never concatenated — and each head's context is stored directly into
    its o_ref lane slice.
    """
    wp = wp_ref[0]                       # [Wl, 4H] bf16
    ep = ep_ref[0]                       # [El, 4H] bf16
    mask = m_ref[0]                      # [1, T] additive mask (f32)
    mask_w = mask[:, :word_len]          # hoisted out of the head loop
    mask_e = mask[:, word_len:]

    dn = (((1,), (1,)), ((), ()))        # contract head_dim, no batch dims
    k_off = 2 * hidden
    v_off = 3 * hidden

    def attend(qp, row_start, rows):
        for h in range(num_heads):       # static unroll over heads
            s = h * head_dim
            q_w = qp[:, s:s + head_dim]                      # vs word keys
            q_e = qp[:, hidden + s:hidden + s + head_dim]    # vs entity keys
            k_w = wp[:, k_off + s:k_off + s + head_dim]
            k_e = ep[:, k_off + s:k_off + s + head_dim]
            v_w = wp[:, v_off + s:v_off + s + head_dim]
            v_e = ep[:, v_off + s:v_off + s + head_dim]

            s_w = jax.lax.dot_general(
                q_w, k_w, dn, preferred_element_type=jnp.float32) + mask_w
            s_e = jax.lax.dot_general(
                q_e, k_e, dn, preferred_element_type=jnp.float32) + mask_e

            m = jnp.maximum(jnp.max(s_w, axis=-1, keepdims=True),
                            jnp.max(s_e, axis=-1, keepdims=True))
            p_w = jnp.exp(s_w - m)
            p_e = jnp.exp(s_e - m)
            inv = pl.reciprocal(jnp.sum(p_w, axis=-1, keepdims=True)
                                + jnp.sum(p_e, axis=-1, keepdims=True),
                                approx=True)
            ctx = (jnp.dot(p_w.astype(jnp.bfloat16), v_w,
                           preferred_element_type=jnp.float32)
                   + jnp.dot(p_e.astype(jnp.bfloat16), v_e,
                             preferred_element_type=jnp.float32))
            # Per-head direct store: bounds live ranges, no trailing concat.
            o_ref[0, row_start:row_start + rows, s:s + head_dim] = \
                (ctx * inv).astype(o_ref.dtype)

    attend(wp, 0, word_len)
    attend(ep, word_len, ent_len)


# ----------------------------------------------------------------------------
# Pallas wrappers
# ----------------------------------------------------------------------------

def linear(x, w, b, *, activation=None, out_dtype=jnp.float32,
           tm_target=None, tn_target=None, tk_target=None):
    M, K = x.shape
    N = w.shape[1]
    tm = _tile(M, tm_target or _CFG["tm"], 8)
    tn = _tile(N, tn_target or _CFG["tn"], 128)
    tk = _tile(K, tk_target or _CFG["tk"], 128)
    grid = (M // tm, N // tn, K // tk)
    kern = functools.partial(_matmul_kernel, activation=activation)
    return pl.pallas_call(
        kern,
        out_shape=jax.ShapeDtypeStruct((M, N), out_dtype),
        grid=grid,
        in_specs=[
            pl.BlockSpec((tm, tk), lambda i, j, k: (i, k)),
            pl.BlockSpec((tk, tn), lambda i, j, k: (k, j)),
            pl.BlockSpec((1, tn), lambda i, j, k: (0, j)),
        ],
        out_specs=pl.BlockSpec((tm, tn), lambda i, j, k: (i, j)),
        scratch_shapes=[pltpu.VMEM((tm, tn), jnp.float32)],
        compiler_params=pltpu.CompilerParams(
            dimension_semantics=("parallel", "parallel", "arbitrary"),
            vmem_limit_bytes=_CFG["vmem_limit"],
        ),
    )(x, w, b.reshape(1, -1))


def linear_residual_layernorm(x, w, b, residual, gamma, beta, *, eps=1e-12,
                              tm_target=None, tk_target=None):
    M, K = x.shape
    N = w.shape[1]
    tm = _tile(M, tm_target or _CFG["tm"], 8)
    tk = _tile(K, tk_target or _CFG["tk"], 128)
    grid = (M // tm, K // tk)
    kern = functools.partial(_matmul_res_ln_kernel, eps=eps)
    return pl.pallas_call(
        kern,
        out_shape=jax.ShapeDtypeStruct((M, N), jnp.float32),
        grid=grid,
        in_specs=[
            pl.BlockSpec((tm, tk), lambda i, k: (i, k)),
            pl.BlockSpec((tk, N), lambda i, k: (k, 0)),
            pl.BlockSpec((1, N), lambda i, k: (0, 0)),
            pl.BlockSpec((tm, N), lambda i, k: (i, 0)),
            pl.BlockSpec((1, N), lambda i, k: (0, 0)),
            pl.BlockSpec((1, N), lambda i, k: (0, 0)),
        ],
        out_specs=pl.BlockSpec((tm, N), lambda i, k: (i, 0)),
        scratch_shapes=[pltpu.VMEM((tm, N), jnp.float32)],
        compiler_params=pltpu.CompilerParams(
            dimension_semantics=("parallel", "arbitrary"),
            vmem_limit_bytes=_CFG["vmem_limit"],
        ),
    )(x, w, b.reshape(1, -1), residual, gamma.reshape(1, -1),
      beta.reshape(1, -1))


def entity_aware_attention_core(wproj, eproj, mask3, num_heads, hidden):
    B, Wl, _ = wproj.shape
    El = eproj.shape[1]
    T = Wl + El
    dh = hidden // num_heads
    kern = functools.partial(_attention_kernel, word_len=Wl, ent_len=El,
                             num_heads=num_heads, head_dim=dh, hidden=hidden)
    return pl.pallas_call(
        kern,
        out_shape=jax.ShapeDtypeStruct((B, T, hidden), jnp.bfloat16),
        grid=(B,),
        in_specs=[
            pl.BlockSpec((1, Wl, 4 * hidden), lambda b: (b, 0, 0)),
            pl.BlockSpec((1, El, 4 * hidden), lambda b: (b, 0, 0)),
            pl.BlockSpec((1, 1, T), lambda b: (b, 0, 0)),
        ],
        out_specs=pl.BlockSpec((1, T, hidden), lambda b: (b, 0, 0)),
        compiler_params=pltpu.CompilerParams(
            dimension_semantics=("parallel",),
            vmem_limit_bytes=_CFG["vmem_limit"],
        ),
    )(wproj, eproj, mask3)


# ----------------------------------------------------------------------------
# Parameter preparation (fully fused projections, folded score scale, bf16)
# ----------------------------------------------------------------------------

def prepare_params(raw, num_heads, hidden):
    dh = hidden // num_heads
    inv = 1.0 / math.sqrt(dh)
    bf16 = jnp.bfloat16
    # word rows:   [q | w2e_q | k | v]   (score scale folded into q columns)
    wp_w = jnp.concatenate(
        [raw["q_w"] * inv, raw["w2e_w"] * inv, raw["k_w"], raw["v_w"]], axis=1)
    wp_b = jnp.concatenate(
        [raw["q_b"] * inv, raw["w2e_b"] * inv, raw["k_b"], raw["v_b"]])
    # entity rows: [e2w_q | e2e_q | k | v]
    ep_w = jnp.concatenate(
        [raw["e2w_w"] * inv, raw["e2e_w"] * inv, raw["k_w"], raw["v_w"]], axis=1)
    ep_b = jnp.concatenate(
        [raw["e2w_b"] * inv, raw["e2e_b"] * inv, raw["k_b"], raw["v_b"]])
    return {
        "wp_w": wp_w.astype(bf16), "wp_b": wp_b,
        "ep_w": ep_w.astype(bf16), "ep_b": ep_b,
        "ao_w": raw["ao_w"].astype(bf16), "ao_b": raw["ao_b"],
        "i_w": raw["i_w"].astype(bf16), "i_b": raw["i_b"],
        "o_w": raw["o_w"].astype(bf16), "o_b": raw["o_b"],
        "ln1_g": raw["ln1_g"], "ln1_b": raw["ln1_b"],
        "ln2_g": raw["ln2_g"], "ln2_b": raw["ln2_b"],
    }


# ----------------------------------------------------------------------------
# EntityAwareLayer forward
# ----------------------------------------------------------------------------

def entity_aware_layer(word_h, ent_h, attention_mask, p, num_heads):
    B, Wl, H = word_h.shape
    El = ent_h.shape[1]
    T = Wl + El

    word_flat = word_h.reshape(B * Wl, H)
    ent_flat = ent_h.reshape(B * El, H)

    # Two fused projection matmuls: each hidden state is read exactly once and
    # produces its queries, keys and values in one lane-dense [*, 4H] slab.
    wproj = linear(word_flat, p["wp_w"], p["wp_b"],
                   out_dtype=jnp.bfloat16).reshape(B, Wl, 4 * H)
    eproj = linear(ent_flat, p["ep_w"], p["ep_b"],
                   out_dtype=jnp.bfloat16).reshape(B, El, 4 * H)

    mask3 = attention_mask.reshape(B, 1, T)

    # Entity-aware attention: consumes the projection slabs directly.
    ctx = entity_aware_attention_core(wproj, eproj, mask3, num_heads, H)
    ctx = ctx.reshape(B * T, H)

    # The concatenated hidden states are only needed as the LN1 residual.
    concat_flat = jnp.concatenate([word_h, ent_h], axis=1).reshape(B * T, H)

    # BertSelfOutput: dense + residual + LayerNorm (fused kernel).
    attn_out = linear_residual_layernorm(ctx, p["ao_w"], p["ao_b"],
                                         concat_flat, p["ln1_g"], p["ln1_b"])
    # BertIntermediate: dense + gelu (fused kernel).
    inter = linear(attn_out, p["i_w"], p["i_b"],
                   activation="gelu", out_dtype=jnp.bfloat16)
    # BertOutput: dense + residual + LayerNorm (fused kernel).
    layer_out = linear_residual_layernorm(inter, p["o_w"], p["o_b"],
                                          attn_out, p["ln2_g"], p["ln2_b"])

    layer_out = layer_out.reshape(B, T, H)
    return layer_out[:, :Wl, :], layer_out[:, Wl:, :]


# ----------------------------------------------------------------------------
# Pure-JAX reference (mirrors the PyTorch forward literally) for validation
# ----------------------------------------------------------------------------

def reference(word_h, ent_h, mask, p, num_heads):
    B, Wl, H = word_h.shape
    dh = H // num_heads
    prec = jax.lax.Precision.HIGHEST

    def lin(x, w, b):
        return jnp.dot(x, w, precision=prec) + b

    def tfs(x):
        return x.reshape(B, -1, num_heads, dh).transpose(0, 2, 1, 3)

    w2w_q = tfs(lin(word_h, p["q_w"], p["q_b"]))
    w2e_q = tfs(lin(word_h, p["w2e_w"], p["w2e_b"]))
    e2w_q = tfs(lin(ent_h, p["e2w_w"], p["e2w_b"]))
    e2e_q = tfs(lin(ent_h, p["e2e_w"], p["e2e_b"]))
    cat = jnp.concatenate([word_h, ent_h], axis=1)
    key = tfs(lin(cat, p["k_w"], p["k_b"]))
    val = tfs(lin(cat, p["v_w"], p["v_b"]))

    kw, ke = key[:, :, :Wl], key[:, :, Wl:]
    mm = lambda a, b: jnp.matmul(a, b, precision=prec)
    s_ww = mm(w2w_q, kw.transpose(0, 1, 3, 2))
    s_we = mm(w2e_q, ke.transpose(0, 1, 3, 2))
    s_ew = mm(e2w_q, kw.transpose(0, 1, 3, 2))
    s_ee = mm(e2e_q, ke.transpose(0, 1, 3, 2))
    scores = jnp.concatenate(
        [jnp.concatenate([s_ww, s_we], axis=3),
         jnp.concatenate([s_ew, s_ee], axis=3)], axis=2)
    scores = scores / math.sqrt(dh) + mask
    probs = jax.nn.softmax(scores, axis=-1)
    ctx = mm(probs, val).transpose(0, 2, 1, 3).reshape(B, -1, H)

    def ln(x, g, b):
        mu = x.mean(-1, keepdims=True)
        v = ((x - mu) ** 2).mean(-1, keepdims=True)
        return (x - mu) / jnp.sqrt(v + 1e-12) * g + b

    attn_out = ln(lin(ctx, p["ao_w"], p["ao_b"]) + cat, p["ln1_g"], p["ln1_b"])
    inter = lin(attn_out, p["i_w"], p["i_b"])
    inter = 0.5 * inter * (1.0 + jax.lax.erf(inter / math.sqrt(2.0)))
    out = ln(lin(inter, p["o_w"], p["o_b"]) + attn_out, p["ln2_g"], p["ln2_b"])
    return out[:, :Wl], out[:, Wl:]


# ----------------------------------------------------------------------------
# main
# ----------------------------------------------------------------------------

if __name__ == "__main__":
    B, WORD, ENT = 2, 8, 8
    HIDDEN, HEADS, INTER = 64, 2, 128
    T = WORD + ENT

    key = jax.random.PRNGKey(0)
    ks = jax.random.split(key, 22)

    def w_init(k, i, o):
        return (0.02 * jax.random.normal(k, (i, o))).astype(jnp.float32)

    def b_init(k, o):
        return (0.02 * jax.random.normal(k, (o,))).astype(jnp.float32)

    raw = {
        "q_w": w_init(ks[0], HIDDEN, HIDDEN), "q_b": b_init(ks[1], HIDDEN),
        "k_w": w_init(ks[2], HIDDEN, HIDDEN), "k_b": b_init(ks[3], HIDDEN),
        "v_w": w_init(ks[4], HIDDEN, HIDDEN), "v_b": b_init(ks[5], HIDDEN),
        "w2e_w": w_init(ks[6], HIDDEN, HIDDEN), "w2e_b": b_init(ks[7], HIDDEN),
        "e2w_w": w_init(ks[8], HIDDEN, HIDDEN), "e2w_b": b_init(ks[9], HIDDEN),
        "e2e_w": w_init(ks[10], HIDDEN, HIDDEN), "e2e_b": b_init(ks[11], HIDDEN),
        "ao_w": w_init(ks[12], HIDDEN, HIDDEN), "ao_b": b_init(ks[13], HIDDEN),
        "ln1_g": jnp.ones((HIDDEN,), jnp.float32),
        "ln1_b": jnp.zeros((HIDDEN,), jnp.float32),
        "i_w": w_init(ks[14], HIDDEN, INTER), "i_b": b_init(ks[15], INTER),
        "o_w": w_init(ks[16], INTER, HIDDEN), "o_b": b_init(ks[17], HIDDEN),
        "ln2_g": jnp.ones((HIDDEN,), jnp.float32),
        "ln2_b": jnp.zeros((HIDDEN,), jnp.float32),
    }
    params = prepare_params(raw, HEADS, HIDDEN)

    word_h = jax.random.normal(ks[18], (B, WORD, HIDDEN), dtype=jnp.float32)
    ent_h = jax.random.normal(ks[19], (B, ENT, HIDDEN), dtype=jnp.float32)

    # Standard BERT-style additive mask: 0 for attended, -10000 for masked.
    mask_np = np.zeros((B, 1, 1, T), dtype=np.float32)
    mask_np[1, 0, 0, -3:] = -10000.0
    attention_mask = jnp.asarray(mask_np)

    fwd = jax.jit(entity_aware_layer, static_argnames=("num_heads",))
    word_out, ent_out = fwd(word_h, ent_h, attention_mask, params,
                            num_heads=HEADS)
    word_out = jax.block_until_ready(word_out)
    ent_out = jax.block_until_ready(ent_out)

    ref_word, ref_ent = reference(word_h, ent_h, attention_mask, raw, HEADS)
    np.testing.assert_allclose(np.asarray(word_out), np.asarray(ref_word),
                               rtol=2e-2, atol=2e-2)
    np.testing.assert_allclose(np.asarray(ent_out), np.asarray(ref_ent),
                               rtol=2e-2, atol=2e-2)

    print("KERNEL_OK")
</pallas_src>

<mosaic_0001>
module attributes {stable_mosaic.version = 11 : i64} {
  func.func @_matmul_kernel(%arg0: i32, %arg1: i32, %arg2: i32, %arg3: memref<16x64xf32, #tpu.memory_space<vmem>>, %arg4: memref<64x256xbf16, #tpu.memory_space<vmem>>, %arg5: memref<1x256xf32, #tpu.memory_space<vmem>>, %arg6: memref<16x256xbf16, #tpu.memory_space<vmem>>, %arg7: memref<16x256xf32, #tpu.memory_space<vmem>>) attributes {dimension_semantics = [#tpu.dimension_semantics<parallel>, #tpu.dimension_semantics<parallel>, #tpu.dimension_semantics<arbitrary>], iteration_bounds = array<i64: 1, 1, 1>, scalar_prefetch = 0 : i64, scratch_operands = 1 : i64, tpu.core_type = #tpu.core_type<tc>, window_params = [{transform_indices = @transform_0, window_bounds = array<i64: 16, 64>}, {transform_indices = @transform_1, window_bounds = array<i64: 64, 256>}, {transform_indices = @transform_2, window_bounds = array<i64: 1, 256>}, {transform_indices = @transform_3, window_bounds = array<i64: 16, 256>}]} {
    %c0_i32 = arith.constant 0 : i32
    %0 = arith.cmpi eq, %arg2, %c0_i32 : i32
    %1 = arith.extui %0 : i1 to i32
    %c0_i32_0 = arith.constant 0 : i32
    %2 = arith.cmpi ne, %1, %c0_i32_0 : i32
    scf.if %2 {
      %cst_10 = arith.constant 0.000000e+00 : f32
      %13 = vector.broadcast %cst_10 : f32 to vector<16x256xf32>
      %c0_11 = arith.constant 0 : index
      %c0_12 = arith.constant 0 : index
      %14 = vector.load %arg7[%c0_11, %c0_12] : memref<16x256xf32, #tpu.memory_space<vmem>>, vector<16x256xf32>
      tpu.vector_store %arg7[%c0_11, %c0_12], %13 {strides = array<i32>} : memref<16x256xf32, #tpu.memory_space<vmem>>, vector<16x256xf32>,
    } else {
    }
    %c0 = arith.constant 0 : index
    %c0_1 = arith.constant 0 : index
    %3 = vector.load %arg7[%c0, %c0_1] : memref<16x256xf32, #tpu.memory_space<vmem>>, vector<16x256xf32>
    %c0_2 = arith.constant 0 : index
    %c0_3 = arith.constant 0 : index
    %4 = vector.load %arg3[%c0_2, %c0_3] : memref<16x64xf32, #tpu.memory_space<vmem>>, vector<16x64xf32>
    %5 = arith.truncf %4 : vector<16x64xf32> to vector<16x64xbf16>
    %c0_4 = arith.constant 0 : index
    %c0_5 = arith.constant 0 : index
    %6 = vector.load %arg4[%c0_4, %c0_5] : memref<64x256xbf16, #tpu.memory_space<vmem>>, vector<64x256xbf16>
    %cst = arith.constant dense<0.000000e+00> : vector<16x256xf32>
    %7 = tpu.matmul %5, %6, %cst {dimension_numbers = #tpu.dot_dimension_numbers<[1], [0], [0], [1], [0, 0, 1, 1], [], []>} : vector<16x64xbf16>, vector<64x256xbf16>, vector<16x256xf32> -> vector<16x256xf32>
    %8 = arith.addf %3, %7 : vector<16x256xf32>
    %c0_6 = arith.constant 0 : index
    %c0_7 = arith.constant 0 : index
    %9 = vector.load %arg7[%c0_6, %c0_7] : memref<16x256xf32, #tpu.memory_space<vmem>>, vector<16x256xf32>
    tpu.vector_store %arg7[%c0_6, %c0_7], %8 {strides = array<i32>} : memref<16x256xf32, #tpu.memory_space<vmem>>, vector<16x256xf32>,
    %c0_i32_8 = arith.constant 0 : i32
    %10 = arith.cmpi eq, %arg2, %c0_i32_8 : i32
    %11 = arith.extui %10 : i1 to i32
    %c0_i32_9 = arith.constant 0 : i32
    %12 = arith.cmpi ne, %11, %c0_i32_9 : i32
    scf.if %12 {
      %c0_10 = arith.constant 0 : index
      %c0_11 = arith.constant 0 : index
      %13 = vector.load %arg7[%c0_10, %c0_11] : memref<16x256xf32, #tpu.memory_space<vmem>>, vector<16x256xf32>
      %c0_12 = arith.constant 0 : index
      %c0_13 = arith.constant 0 : index
      %14 = vector.load %arg5[%c0_12, %c0_13] : memref<1x256xf32, #tpu.memory_space<vmem>>, vector<1x256xf32>
      %15 = vector.broadcast %14 : vector<1x256xf32> to vector<16x256xf32>
      %16 = arith.addf %13, %15 : vector<16x256xf32>
      %17 = arith.truncf %16 : vector<16x256xf32> to vector<16x256xbf16>
      %c0_14 = arith.constant 0 : index
      %c0_15 = arith.constant 0 : index
      %18 = vector.load %arg6[%c0_14, %c0_15] : memref<16x256xbf16, #tpu.memory_space<vmem>>, vector<16x256xbf16>
      tpu.vector_store %arg6[%c0_14, %c0_15], %17 {strides = array<i32>} : memref<16x256xbf16, #tpu.memory_space<vmem>>, vector<16x256xbf16>,
    } else {
    }
    return
  }
  func.func @transform_0(%arg0: i32, %arg1: i32, %arg2: i32) -> (i32, i32) {
    %c0_i32 = arith.constant 0 : i32
    return %arg0, %arg2 : i32, i32
  }
  func.func @transform_1(%arg0: i32, %arg1: i32, %arg2: i32) -> (i32, i32) {
    %c0_i32 = arith.constant 0 : i32
    return %arg2, %arg1 : i32, i32
  }
  func.func @transform_2(%arg0: i32, %arg1: i32, %arg2: i32) -> (i32, i32) {
    %c0_i32 = arith.constant 0 : i32
    %c0_i32_0 = arith.constant 0 : i32
    return %c0_i32, %arg1 : i32, i32
  }
  func.func @transform_3(%arg0: i32, %arg1: i32, %arg2: i32) -> (i32, i32) {
    %c0_i32 = arith.constant 0 : i32
    return %arg0, %arg1 : i32, i32
  }
}

module attributes {stable_mosaic.version = 11 : i64} {
  func.func @_matmul_kernel(%arg0: i32, %arg1: i32, %arg2: i32, %arg3: memref<16x64xf32, #tpu.memory_space<vmem>>, %arg4: memref<64x256xbf16, #tpu.memory_space<vmem>>, %arg5: memref<1x256xf32, #tpu.memory_space<vmem>>, %arg6: memref<16x256xbf16, #tpu.memory_space<vmem>>, %arg7: memref<16x256xf32, #tpu.memory_space<vmem>>) attributes {dimension_semantics = [#tpu.dimension_semantics<parallel>, #tpu.dimension_semantics<parallel>, #tpu.dimension_semantics<arbitrary>], iteration_bounds = array<i64: 1, 1, 1>, scalar_prefetch = 0 : i64, scratch_operands = 1 : i64, tpu.core_type = #tpu.core_type<tc>, window_params = [{transform_indices = @transform_0, window_bounds = array<i64: 16, 64>}, {transform_indices = @transform_1, window_bounds = array<i64: 64, 256>}, {transform_indices = @transform_2, window_bounds = array<i64: 1, 256>}, {transform_indices = @transform_3, window_bounds = array<i64: 16, 256>}]} {
    %c0_i32 = arith.constant 0 : i32
    %0 = arith.cmpi eq, %arg2, %c0_i32 : i32
    %1 = arith.extui %0 : i1 to i32
    %c0_i32_0 = arith.constant 0 : i32
    %2 = arith.cmpi ne, %1, %c0_i32_0 : i32
    scf.if %2 {
      %cst_10 = arith.constant 0.000000e+00 : f32
      %13 = vector.broadcast %cst_10 : f32 to vector<16x256xf32>
      %c0_11 = arith.constant 0 : index
      %c0_12 = arith.constant 0 : index
      %14 = vector.load %arg7[%c0_11, %c0_12] : memref<16x256xf32, #tpu.memory_space<vmem>>, vector<16x256xf32>
      tpu.vector_store %arg7[%c0_11, %c0_12], %13 {strides = array<i32>} : memref<16x256xf32, #tpu.memory_space<vmem>>, vector<16x256xf32>,
    } else {
    }
    %c0 = arith.constant 0 : index
    %c0_1 = arith.constant 0 : index
    %3 = vector.load %arg7[%c0, %c0_1] : memref<16x256xf32, #tpu.memory_space<vmem>>, vector<16x256xf32>
    %c0_2 = arith.constant 0 : index
    %c0_3 = arith.constant 0 : index
    %4 = vector.load %arg3[%c0_2, %c0_3] : memref<16x64xf32, #tpu.memory_space<vmem>>, vector<16x64xf32>
    %5 = arith.truncf %4 : vector<16x64xf32> to vector<16x64xbf16>
    %c0_4 = arith.constant 0 : index
    %c0_5 = arith.constant 0 : index
    %6 = vector.load %arg4[%c0_4, %c0_5] : memref<64x256xbf16, #tpu.memory_space<vmem>>, vector<64x256xbf16>
    %cst = arith.constant dense<0.000000e+00> : vector<16x256xf32>
    %7 = tpu.matmul %5, %6, %cst {dimension_numbers = #tpu.dot_dimension_numbers<[1], [0], [0], [1], [0, 0, 1, 1], [], []>} : vector<16x64xbf16>, vector<64x256xbf16>, vector<16x256xf32> -> vector<16x256xf32>
    %8 = arith.addf %3, %7 : vector<16x256xf32>
    %c0_6 = arith.constant 0 : index
    %c0_7 = arith.constant 0 : index
    %9 = vector.load %arg7[%c0_6, %c0_7] : memref<16x256xf32, #tpu.memory_space<vmem>>, vector<16x256xf32>
    tpu.vector_store %arg7[%c0_6, %c0_7], %8 {strides = array<i32>} : memref<16x256xf32, #tpu.memory_space<vmem>>, vector<16x256xf32>,
    %c0_i32_8 = arith.constant 0 : i32
    %10 = arith.cmpi eq, %arg2, %c0_i32_8 : i32
    %11 = arith.extui %10 : i1 to i32
    %c0_i32_9 = arith.constant 0 : i32
    %12 = arith.cmpi ne, %11, %c0_i32_9 : i32
    scf.if %12 {
      %c0_10 = arith.constant 0 : index
      %c0_11 = arith.constant 0 : index
      %13 = vector.load %arg7[%c0_10, %c0_11] : memref<16x256xf32, #tpu.memory_space<vmem>>, vector<16x256xf32>
      %c0_12 = arith.constant 0 : index
      %c0_13 = arith.constant 0 : index
      %14 = vector.load %arg5[%c0_12, %c0_13] : memref<1x256xf32, #tpu.memory_space<vmem>>, vector<1x256xf32>
      %15 = vector.broadcast %14 : vector<1x256xf32> to vector<16x256xf32>
      %16 = arith.addf %13, %15 : vector<16x256xf32>
      %17 = arith.truncf %16 : vector<16x256xf32> to vector<16x256xbf16>
      %c0_14 = arith.constant 0 : index
      %c0_15 = arith.constant 0 : index
      %18 = vector.load %arg6[%c0_14, %c0_15] : memref<16x256xbf16, #tpu.memory_space<vmem>>, vector<16x256xbf16>
      tpu.vector_store %arg6[%c0_14, %c0_15], %17 {strides = array<i32>} : memref<16x256xbf16, #tpu.memory_space<vmem>>, vector<16x256xbf16>,
    } else {
    }
    return
  }
  func.func @transform_0(%arg0: i32, %arg1: i32, %arg2: i32) -> (i32, i32) {
    %c0_i32 = arith.constant 0 : i32
    return %arg0, %arg2 : i32, i32
  }
  func.func @transform_1(%arg0: i32, %arg1: i32, %arg2: i32) -> (i32, i32) {
    %c0_i32 = arith.constant 0 : i32
    return %arg2, %arg1 : i32, i32
  }
  func.func @transform_2(%arg0: i32, %arg1: i32, %arg2: i32) -> (i32, i32) {
    %c0_i32 = arith.constant 0 : i32
    %c0_i32_0 = arith.constant 0 : i32
    return %c0_i32, %arg1 : i32, i32
  }
  func.func @transform_3(%arg0: i32, %arg1: i32, %arg2: i32) -> (i32, i32) {
    %c0_i32 = arith.constant 0 : i32
    return %arg0, %arg1 : i32, i32
  }
}

module attributes {stable_mosaic.version = 11 : i64} {
  func.func @_attention_kernel(%arg0: i32, %arg1: memref<1x8x256xbf16, #tpu.memory_space<vmem>>, %arg2: memref<1x8x256xbf16, #tpu.memory_space<vmem>>, %arg3: memref<1x1x16xf32, #tpu.memory_space<vmem>>, %arg4: memref<1x16x64xbf16, #tpu.memory_space<vmem>>) attributes {dimension_semantics = [#tpu.dimension_semantics<parallel>], iteration_bounds = array<i64: 2>, scalar_prefetch = 0 : i64, scratch_operands = 0 : i64, tpu.core_type = #tpu.core_type<tc>, window_params = [{transform_indices = @transform_0, window_bounds = array<i64: 1, 8, 256>}, {transform_indices = @transform_1, window_bounds = array<i64: 1, 8, 256>}, {transform_indices = @transform_2, window_bounds = array<i64: 1, 1, 16>}, {transform_indices = @transform_3, window_bounds = array<i64: 1, 16, 64>}]} {
    %c0 = arith.constant 0 : index
    %c0_0 = arith.constant 0 : index
    %c0_1 = arith.constant 0 : index
    %0 = vector.load %arg1[%c0, %c0_0, %c0_1] : memref<1x8x256xbf16, #tpu.memory_space<vmem>>, vector<1x8x256xbf16>
    %1 = vector.shape_cast %0 : vector<1x8x256xbf16> to vector<8x256xbf16>
    %c0_2 = arith.constant 0 : index
    %c0_3 = arith.constant 0 : index
    %c0_4 = arith.constant 0 : index
    %2 = vector.load %arg2[%c0_2, %c0_3, %c0_4] : memref<1x8x256xbf16, #tpu.memory_space<vmem>>, vector<1x8x256xbf16>
    %3 = vector.shape_cast %2 : vector<1x8x256xbf16> to vector<8x256xbf16>
    %c0_5 = arith.constant 0 : index
    %c0_6 = arith.constant 0 : index
    %c0_7 = arith.constant 0 : index
    %4 = vector.load %arg3[%c0_5, %c0_6, %c0_7] : memref<1x1x16xf32, #tpu.memory_space<vmem>>, vector<1x1x16xf32>
    %5 = vector.shape_cast %4 : vector<1x1x16xf32> to vector<1x16xf32>
    %6 = vector.extract_strided_slice %5 {offsets = [0, 0], sizes = [1, 8], strides = [1, 1]} : vector<1x16xf32> to vector<1x8xf32>
    %7 = vector.extract_strided_slice %5 {offsets = [0, 8], sizes = [1, 8], strides = [1, 1]} : vector<1x16xf32> to vector<1x8xf32>
    %8 = vector.extract_strided_slice %1 {offsets = [0, 0], sizes = [8, 32], strides = [1, 1]} : vector<8x256xbf16> to vector<8x32xbf16>
    %9 = vector.extract_strided_slice %1 {offsets = [0, 64], sizes = [8, 32], strides = [1, 1]} : vector<8x256xbf16> to vector<8x32xbf16>
    %10 = vector.extract_strided_slice %1 {offsets = [0, 128], sizes = [8, 32], strides = [1, 1]} : vector<8x256xbf16> to vector<8x32xbf16>
    %11 = vector.extract_strided_slice %3 {offsets = [0, 128], sizes = [8, 32], strides = [1, 1]} : vector<8x256xbf16> to vector<8x32xbf16>
    %12 = vector.extract_strided_slice %1 {offsets = [0, 192], sizes = [8, 32], strides = [1, 1]} : vector<8x256xbf16> to vector<8x32xbf16>
    %13 = vector.extract_strided_slice %3 {offsets = [0, 192], sizes = [8, 32], strides = [1, 1]} : vector<8x256xbf16> to vector<8x32xbf16>
    %cst = arith.constant dense<0.000000e+00> : vector<8x8xf32>
    %14 = tpu.matmul %8, %10, %cst {dimension_numbers = #tpu.dot_dimension_numbers<[1], [1], [0], [0], [0, 0, 1, 0], [], []>} : vector<8x32xbf16>, vector<8x32xbf16>, vector<8x8xf32> -> vector<8x8xf32>
    %15 = vector.broadcast %6 : vector<1x8xf32> to vector<8x8xf32>
    %16 = arith.addf %14, %15 : vector<8x8xf32>
    %cst_8 = arith.constant dense<0.000000e+00> : vector<8x8xf32>
    %17 = tpu.matmul %9, %11, %cst_8 {dimension_numbers = #tpu.dot_dimension_numbers<[1], [1], [0], [0], [0, 0, 1, 0], [], []>} : vector<8x32xbf16>, vector<8x32xbf16>, vector<8x8xf32> -> vector<8x8xf32>
    %18 = vector.broadcast %7 : vector<1x8xf32> to vector<8x8xf32>
    %19 = arith.addf %17, %18 : vector<8x8xf32>
    %cst_9 = arith.constant dense<0xFF800000> : vector<8xf32>
    %20 = vector.multi_reduction <maximumf>, %16, %cst_9 [1] : vector<8x8xf32> to vector<8xf32>
    %21 = vector.shape_cast %20 : vector<8xf32> to vector<8x1xf32>
    %cst_10 = arith.constant dense<0xFF800000> : vector<8xf32>
    %22 = vector.multi_reduction <maximumf>, %19, %cst_10 [1] : vector<8x8xf32> to vector<8xf32>
    %23 = vector.shape_cast %22 : vector<8xf32> to vector<8x1xf32>
    %24 = arith.maximumf %21, %23 : vector<8x1xf32>
    %25 = vector.broadcast %24 : vector<8x1xf32> to vector<8x8xf32>
    %26 = arith.subf %16, %25 : vector<8x8xf32>
    %27 = math.exp %26 : vector<8x8xf32>
    %28 = vector.broadcast %24 : vector<8x1xf32> to vector<8x8xf32>
    %29 = arith.subf %19, %28 : vector<8x8xf32>
    %30 = math.exp %29 : vector<8x8xf32>
    %cst_11 = arith.constant dense<0.000000e+00> : vector<8xf32>
    %31 = vector.multi_reduction <add>, %27, %cst_11 [1] : vector<8x8xf32> to vector<8xf32>
    %32 = vector.shape_cast %31 : vector<8xf32> to vector<8x1xf32>
    %cst_12 = arith.constant dense<0.000000e+00> : vector<8xf32>
    %33 = vector.multi_reduction <add>, %30, %cst_12 [1] : vector<8x8xf32> to vector<8xf32>
    %34 = vector.shape_cast %33 : vector<8xf32> to vector<8x1xf32>
    %35 = arith.addf %32, %34 : vector<8x1xf32>
    %36 = tpu.reciprocal %35 {approx = true} : vector<8x1xf32> -> vector<8x1xf32>
    %37 = arith.truncf %27 : vector<8x8xf32> to vector<8x8xbf16>
    %cst_13 = arith.constant dense<0.000000e+00> : vector<8x32xf32>
    %38 = tpu.matmul %37, %12, %cst_13 {dimension_numbers = #tpu.dot_dimension_numbers<[1], [0], [0], [1], [0, 0, 1, 1], [], []>} : vector<8x8xbf16>, vector<8x32xbf16>, vector<8x32xf32> -> vector<8x32xf32>
    %39 = arith.truncf %30 : vector<8x8xf32> to vector<8x8xbf16>
    %cst_14 = arith.constant dense<0.000000e+00> : vector<8x32xf32>
    %40 = tpu.matmul %39, %13, %cst_14 {dimension_numbers = #tpu.dot_dimension_numbers<[1], [0], [0], [1], [0, 0, 1, 1], [], []>} : vector<8x8xbf16>, vector<8x32xbf16>, vector<8x32xf32> -> vector<8x32xf32>
    %41 = arith.addf %38, %40 : vector<8x32xf32>
    %42 = vector.broadcast %36 : vector<8x1xf32> to vector<8x32xf32>
    %43 = arith.mulf %41, %42 : vector<8x32xf32>
    %44 = arith.truncf %43 : vector<8x32xf32> to vector<8x32xbf16>
    %c0_15 = arith.constant 0 : index
    %c0_16 = arith.constant 0 : index
    %c0_17 = arith.constant 0 : index
    %45 = vector.load %arg4[%c0_15, %c0_16, %c0_17] : memref<1x16x64xbf16, #tpu.memory_space<vmem>>, vector<1x8x32xbf16>
    %46 = vector.shape_cast %45 : vector<1x8x32xbf16> to vector<8x32xbf16>
    %47 = vector.shape_cast %44 : vector<8x32xbf16> to vector<1x8x32xbf16>
    tpu.vector_store %arg4[%c0_15, %c0_16, %c0_17], %47 {strides = array<i32>} : memref<1x16x64xbf16, #tpu.memory_space<vmem>>, vector<1x8x32xbf16>,
    %48 = vector.extract_strided_slice %1 {offsets = [0, 32], sizes = [8, 32], strides = [1, 1]} : vector<8x256xbf16> to vector<8x32xbf16>
    %49 = vector.extract_strided_slice %1 {offsets = [0, 96], sizes = [8, 32], strides = [1, 1]} : vector<8x256xbf16> to vector<8x32xbf16>
    %50 = vector.extract_strided_slice %1 {offsets = [0, 160], sizes = [8, 32], strides = [1, 1]} : vector<8x256xbf16> to vector<8x32xbf16>
    %51 = vector.extract_strided_slice %3 {offsets = [0, 160], sizes = [8, 32], strides = [1, 1]} : vector<8x256xbf16> to vector<8x32xbf16>
    %52 = vector.extract_strided_slice %1 {offsets = [0, 224], sizes = [8, 32], strides = [1, 1]} : vector<8x256xbf16> to vector<8x32xbf16>
    %53 = vector.extract_strided_slice %3 {offsets = [0, 224], sizes = [8, 32], strides = [1, 1]} : vector<8x256xbf16> to vector<8x32xbf16>
    %cst_18 = arith.constant dense<0.000000e+00> : vector<8x8xf32>
    %54 = tpu.matmul %48, %50, %cst_18 {dimension_numbers = #tpu.dot_dimension_numbers<[1], [1], [0], [0], [0, 0, 1, 0], [], []>} : vector<8x32xbf16>, vector<8x32xbf16>, vector<8x8xf32> -> vector<8x8xf32>
    %55 = vector.broadcast %6 : vector<1x8xf32> to vector<8x8xf32>
    %56 = arith.addf %54, %55 : vector<8x8xf32>
    %cst_19 = arith.constant dense<0.000000e+00> : vector<8x8xf32>
    %57 = tpu.matmul %49, %51, %cst_19 {dimension_numbers = #tpu.dot_dimension_numbers<[1], [1], [0], [0], [0, 0, 1, 0], [], []>} : vector<8x32xbf16>, vector<8x32xbf16>, vector<8x8xf32> -> vector<8x8xf32>
    %58 = vector.broadcast %7 : vector<1x8xf32> to vector<8x8xf32>
    %59 = arith.addf %57, %58 : vector<8x8xf32>
    %cst_20 = arith.constant dense<0xFF800000> : vector<8xf32>
    %60 = vector.multi_reduction <maximumf>, %56, %cst_20 [1] : vector<8x8xf32> to vector<8xf32>
    %61 = vector.shape_cast %60 : vector<8xf32> to vector<8x1xf32>
    %cst_21 = arith.constant dense<0xFF800000> : vector<8xf32>
    %62 = vector.multi_reduction <maximumf>, %59, %cst_21 [1] : vector<8x8xf32> to vector<8xf32>
    %63 = vector.shape_cast %62 : vector<8xf32> to vector<8x1xf32>
    %64 = arith.maximumf %61, %63 : vector<8x1xf32>
    %65 = vector.broadcast %64 : vector<8x1xf32> to vector<8x8xf32>
    %66 = arith.subf %56, %65 : vector<8x8xf32>
    %67 = math.exp %66 : vector<8x8xf32>
    %68 = vector.broadcast %64 : vector<8x1xf32> to vector<8x8xf32>
    %69 = arith.subf %59, %68 : vector<8x8xf32>
    %70 = math.exp %69 : vector<8x8xf32>
    %cst_22 = arith.constant dense<0.000000e+00> : vector<8xf32>
    %71 = vector.multi_reduction <add>, %67, %cst_22 [1] : vector<8x8xf32> to vector<8xf32>
    %72 = vector.shape_cast %71 : vector<8xf32> to vector<8x1xf32>
    %cst_23 = arith.constant dense<0.000000e+00> : vector<8xf32>
    %73 = vector.multi_reduction <add>, %70, %cst_23 [1] : vector<8x8xf32> to vector<8xf32>
    %74 = vector.shape_cast %73 : vector<8xf32> to vector<8x1xf32>
    %75 = arith.addf %72, %74 : vector<8x1xf32>
    %76 = tpu.reciprocal %75 {approx = true} : vector<8x1xf32> -> vector<8x1xf32>
    %77 = arith.truncf %67 : vector<8x8xf32> to vector<8x8xbf16>
    %cst_24 = arith.constant dense<0.000000e+00> : vector<8x32xf32>
    %78 = tpu.matmul %77, %52, %cst_24 {dimension_numbers = #tpu.dot_dimension_numbers<[1], [0], [0], [1], [0, 0, 1, 1], [], []>} : vector<8x8xbf16>, vector<8x32xbf16>, vector<8x32xf32> -> vector<8x32xf32>
    %79 = arith.truncf %70 : vector<8x8xf32> to vector<8x8xbf16>
    %cst_25 = arith.constant dense<0.000000e+00> : vector<8x32xf32>
    %80 = tpu.matmul %79, %53, %cst_25 {dimension_numbers = #tpu.dot_dimension_numbers<[1], [0], [0], [1], [0, 0, 1, 1], [], []>} : vector<8x8xbf16>, vector<8x32xbf16>, vector<8x32xf32> -> vector<8x32xf32>
    %81 = arith.addf %78, %80 : vector<8x32xf32>
    %82 = vector.broadcast %76 : vector<8x1xf32> to vector<8x32xf32>
    %83 = arith.mulf %81, %82 : vector<8x32xf32>
    %84 = arith.truncf %83 : vector<8x32xf32> to vector<8x32xbf16>
    %c0_26 = arith.constant 0 : index
    %c0_27 = arith.constant 0 : index
    %c32 = arith.constant 32 : index
    %85 = vector.load %arg4[%c0_26, %c0_27, %c32] : memref<1x16x64xbf16, #tpu.memory_space<vmem>>, vector<1x8x32xbf16>
    %86 = vector.shape_cast %85 : vector<1x8x32xbf16> to vector<8x32xbf16>
    %87 = vector.shape_cast %84 : vector<8x32xbf16> to vector<1x8x32xbf16>
    tpu.vector_store %arg4[%c0_26, %c0_27, %c32], %87 {strides = array<i32>} : memref<1x16x64xbf16, #tpu.memory_space<vmem>>, vector<1x8x32xbf16>,
    %88 = vector.extract_strided_slice %3 {offsets = [0, 0], sizes = [8, 32], strides = [1, 1]} : vector<8x256xbf16> to vector<8x32xbf16>
    %89 = vector.extract_strided_slice %3 {offsets = [0, 64], sizes = [8, 32], strides = [1, 1]} : vector<8x256xbf16> to vector<8x32xbf16>
    %90 = vector.extract_strided_slice %1 {offsets = [0, 128], sizes = [8, 32], strides = [1, 1]} : vector<8x256xbf16> to vector<8x32xbf16>
    %91 = vector.extract_strided_slice %3 {offsets = [0, 128], sizes = [8, 32], strides = [1, 1]} : vector<8x256xbf16> to vector<8x32xbf16>
    %92 = vector.extract_strided_slice %1 {offsets = [0, 192], sizes = [8, 32], strides = [1, 1]} : vector<8x256xbf16> to vector<8x32xbf16>
    %93 = vector.extract_strided_slice %3 {offsets = [0, 192], sizes = [8, 32], strides = [1, 1]} : vector<8x256xbf16> to vector<8x32xbf16>
    %cst_28 = arith.constant dense<0.000000e+00> : vector<8x8xf32>
    %94 = tpu.matmul %88, %90, %cst_28 {dimension_numbers = #tpu.dot_dimension_numbers<[1], [1], [0], [0], [0, 0, 1, 0], [], []>} : vector<8x32xbf16>, vector<8x32xbf16>, vector<8x8xf32> -> vector<8x8xf32>
    %95 = vector.broadcast %6 : vector<1x8xf32> to vector<8x8xf32>
    %96 = arith.addf %94, %95 : vector<8x8xf32>
    %cst_29 = arith.constant dense<0.000000e+00> : vector<8x8xf32>
    %97 = tpu.matmul %89, %91, %cst_29 {dimension_numbers = #tpu.dot_dimension_numbers<[1], [1], [0], [0], [0, 0, 1, 0], [], []>} : vector<8x32xbf16>, vector<8x32xbf16>, vector<8x8xf32> -> vector<8x8xf32>
    %98 = vector.broadcast %7 : vector<1x8xf32> to vector<8x8xf32>
    %99 = arith.addf %97, %98 : vector<8x8xf32>
    %cst_30 = arith.constant dense<0xFF800000> : vector<8xf32>
    %100 = vector.multi_reduction <maximumf>, %96, %cst_30 [1] : vector<8x8xf32> to vector<8xf32>
    %101 = vector.shape_cast %100 : vector<8xf32> to vector<8x1xf32>
    %cst_31 = arith.constant dense<0xFF800000> : vector<8xf32>
    %102 = vector.multi_reduction <maximumf>, %99, %cst_31 [1] : vector<8x8xf32> to vector<8xf32>
    %103 = vector.shape_cast %102 : vector<8xf32> to vector<8x1xf32>
    %104 = arith.maximumf %101, %103 : vector<8x1xf32>
    %105 = vector.broadcast %104 : vector<8x1xf32> to vector<8x8xf32>
    %106 = arith.subf %96, %105 : vector<8x8xf32>
    %107 = math.exp %106 : vector<8x8xf32>
    %108 = vector.broadcast %104 : vector<8x1xf32> to vector<8x8xf32>
    %109 = arith.subf %99, %108 : vector<8x8xf32>
    %110 = math.exp %109 : vector<8x8xf32>
    %cst_32 = arith.constant dense<0.000000e+00> : vector<8xf32>
    %111 = vector.multi_reduction <add>, %107, %cst_32 [1] : vector<8x8xf32> to vector<8xf32>
    %112 = vector.shape_cast %111 : vector<8xf32> to vector<8x1xf32>
    %cst_33 = arith.constant dense<0.000000e+00> : vector<8xf32>
    %113 = vector.multi_reduction <add>, %110, %cst_33 [1] : vector<8x8xf32> to vector<8xf32>
    %114 = vector.shape_cast %113 : vector<8xf32> to vector<8x1xf32>
    %115 = arith.addf %112, %114 : vector<8x1xf32>
    %116 = tpu.reciprocal %115 {approx = true} : vector<8x1xf32> -> vector<8x1xf32>
    %117 = arith.truncf %107 : vector<8x8xf32> to vector<8x8xbf16>
    %cst_34 = arith.constant dense<0.000000e+00> : vector<8x32xf32>
    %118 = tpu.matmul %117, %92, %cst_34 {dimension_numbers = #tpu.dot_dimension_numbers<[1], [0], [0], [1], [0, 0, 1, 1], [], []>} : vector<8x8xbf16>, vector<8x32xbf16>, vector<8x32xf32> -> vector<8x32xf32>
    %119 = arith.truncf %110 : vector<8x8xf32> to vector<8x8xbf16>
    %cst_35 = arith.constant dense<0.000000e+00> : vector<8x32xf32>
    %120 = tpu.matmul %119, %93, %cst_35 {dimension_numbers = #tpu.dot_dimension_numbers<[1], [0], [0], [1], [0, 0, 1, 1], [], []>} : vector<8x8xbf16>, vector<8x32xbf16>, vector<8x32xf32> -> vector<8x32xf32>
    %121 = arith.addf %118, %120 : vector<8x32xf32>
    %122 = vector.broadcast %116 : vector<8x1xf32> to vector<8x32xf32>
    %123 = arith.mulf %121, %122 : vector<8x32xf32>
    %124 = arith.truncf %123 : vector<8x32xf32> to vector<8x32xbf16>
    %c0_36 = arith.constant 0 : index
    %c8 = arith.constant 8 : index
    %c0_37 = arith.constant 0 : index
    %125 = vector.load %arg4[%c0_36, %c8, %c0_37] : memref<1x16x64xbf16, #tpu.memory_space<vmem>>, vector<1x8x32xbf16>
    %126 = vector.shape_cast %125 : vector<1x8x32xbf16> to vector<8x32xbf16>
    %127 = vector.shape_cast %124 : vector<8x32xbf16> to vector<1x8x32xbf16>
    tpu.vector_store %arg4[%c0_36, %c8, %c0_37], %127 {strides = array<i32>} : memref<1x16x64xbf16, #tpu.memory_space<vmem>>, vector<1x8x32xbf16>,
    %128 = vector.extract_strided_slice %3 {offsets = [0, 32], sizes = [8, 32], strides = [1, 1]} : vector<8x256xbf16> to vector<8x32xbf16>
    %129 = vector.extract_strided_slice %3 {offsets = [0, 96], sizes = [8, 32], strides = [1, 1]} : vector<8x256xbf16> to vector<8x32xbf16>
    %130 = vector.extract_strided_slice %1 {offsets = [0, 160], sizes = [8, 32], strides = [1, 1]} : vector<8x256xbf16> to vector<8x32xbf16>
    %131 = vector.extract_strided_slice %3 {offsets = [0, 160], sizes = [8, 32], strides = [1, 1]} : vector<8x256xbf16> to vector<8x32xbf16>
    %132 = vector.extract_strided_slice %1 {offsets = [0, 224], sizes = [8, 32], strides = [1, 1]} : vector<8x256xbf16> to vector<8x32xbf16>
    %133 = vector.extract_strided_slice %3 {offsets = [0, 224], sizes = [8, 32], strides = [1, 1]} : vector<8x256xbf16> to vector<8x32xbf16>
    %cst_38 = arith.constant dense<0.000000e+00> : vector<8x8xf32>
    %134 = tpu.matmul %128, %130, %cst_38 {dimension_numbers = #tpu.dot_dimension_numbers<[1], [1], [0], [0], [0, 0, 1, 0], [], []>} : vector<8x32xbf16>, vector<8x32xbf16>, vector<8x8xf32> -> vector<8x8xf32>
    %135 = vector.broadcast %6 : vector<1x8xf32> to vector<8x8xf32>
    %136 = arith.addf %134, %135 : vector<8x8xf32>
    %cst_39 = arith.constant dense<0.000000e+00> : vector<8x8xf32>
    %137 = tpu.matmul %129, %131, %cst_39 {dimension_numbers = #tpu.dot_dimension_numbers<[1], [1], [0], [0], [0, 0, 1, 0], [], []>} : vector<8x32xbf16>, vector<8x32xbf16>, vector<8x8xf32> -> vector<8x8xf32>
    %138 = vector.broadcast %7 : vector<1x8xf32> to vector<8x8xf32>
    %139 = arith.addf %137, %138 : vector<8x8xf32>
    %cst_40 = arith.constant dense<0xFF800000> : vector<8xf32>
    %140 = vector.multi_reduction <maximumf>, %136, %cst_40 [1] : vector<8x8xf32> to vector<8xf32>
    %141 = vector.shape_cast %140 : vector<8xf32> to vector<8x1xf32>
    %cst_41 = arith.constant dense<0xFF800000> : vector<8xf32>
    %142 = vector.multi_reduction <maximumf>, %139, %cst_41 [1] : vector<8x8xf32> to vector<8xf32>
    %143 = vector.shape_cast %142 : vector<8xf32> to vector<8x1xf32>
    %144 = arith.maximumf %141, %143 : vector<8x1xf32>
    %145 = vector.broadcast %144 : vector<8x1xf32> to vector<8x8xf32>
    %146 = arith.subf %136, %145 : vector<8x8xf32>
    %147 = math.exp %146 : vector<8x8xf32>
    %148 = vector.broadcast %144 : vector<8x1xf32> to vector<8x8xf32>
    %149 = arith.subf %139, %148 : vector<8x8xf32>
    %150 = math.exp %149 : vector<8x8xf32>
    %cst_42 = arith.constant dense<0.000000e+00> : vector<8xf32>
    %151 = vector.multi_reduction <add>, %147, %cst_42 [1] : vector<8x8xf32> to vector<8xf32>
    %152 = vector.shape_cast %151 : vector<8xf32> to vector<8x1xf32>
    %cst_43 = arith.constant dense<0.000000e+00> : vector<8xf32>
    %153 = vector.multi_reduction <add>, %150, %cst_43 [1] : vector<8x8xf32> to vector<8xf32>
    %154 = vector.shape_cast %153 : vector<8xf32> to vector<8x1xf32>
    %155 = arith.addf %152, %154 : vector<8x1xf32>
    %156 = tpu.reciprocal %155 {approx = true} : vector<8x1xf32> -> vector<8x1xf32>
    %157 = arith.truncf %147 : vector<8x8xf32> to vector<8x8xbf16>
    %cst_44 = arith.constant dense<0.000000e+00> : vector<8x32xf32>
    %158 = tpu.matmul %157, %132, %cst_44 {dimension_numbers = #tpu.dot_dimension_numbers<[1], [0], [0], [1], [0, 0, 1, 1], [], []>} : vector<8x8xbf16>, vector<8x32xbf16>, vector<8x32xf32> -> vector<8x32xf32>
    %159 = arith.truncf %150 : vector<8x8xf32> to vector<8x8xbf16>
    %cst_45 = arith.constant dense<0.000000e+00> : vector<8x32xf32>
    %160 = tpu.matmul %159, %133, %cst_45 {dimension_numbers = #tpu.dot_dimension_numbers<[1], [0], [0], [1], [0, 0, 1, 1], [], []>} : vector<8x8xbf16>, vector<8x32xbf16>, vector<8x32xf32> -> vector<8x32xf32>
    %161 = arith.addf %158, %160 : vector<8x32xf32>
    %162 = vector.broadcast %156 : vector<8x1xf32> to vector<8x32xf32>
    %163 = arith.mulf %161, %162 : vector<8x32xf32>
    %164 = arith.truncf %163 : vector<8x32xf32> to vector<8x32xbf16>
    %c0_46 = arith.constant 0 : index
    %c8_47 = arith.constant 8 : index
    %c32_48 = arith.constant 32 : index
    %165 = vector.load %arg4[%c0_46, %c8_47, %c32_48] : memref<1x16x64xbf16, #tpu.memory_space<vmem>>, vector<1x8x32xbf16>
    %166 = vector.shape_cast %165 : vector<1x8x32xbf16> to vector<8x32xbf16>
    %167 = vector.shape_cast %164 : vector<8x32xbf16> to vector<1x8x32xbf16>
    tpu.vector_store %arg4[%c0_46, %c8_47, %c32_48], %167 {strides = array<i32>} : memref<1x16x64xbf16, #tpu.memory_space<vmem>>, vector<1x8x32xbf16>,
    return
  }
  func.func @transform_0(%arg0: i32) -> (i32, i32, i32) {
    %c0_i32 = arith.constant 0 : i32
    %c0_i32_0 = arith.constant 0 : i32
    %c0_i32_1 = arith.constant 0 : i32
    return %arg0, %c0_i32, %c0_i32_0 : i32, i32, i32
  }
  func.func @transform_1(%arg0: i32) -> (i32, i32, i32) {
    %c0_i32 = arith.constant 0 : i32
    %c0_i32_0 = arith.constant 0 : i32
    %c0_i32_1 = arith.constant 0 : i32
    return %arg0, %c0_i32, %c0_i32_0 : i32, i32, i32
  }
  func.func @transform_2(%arg0: i32) -> (i32, i32, i32) {
    %c0_i32 = arith.constant 0 : i32
    %c0_i32_0 = arith.constant 0 : i32
    %c0_i32_1 = arith.constant 0 : i32
    return %arg0, %c0_i32, %c0_i32_0 : i32, i32, i32
  }
  func.func @transform_3(%arg0: i32) -> (i32, i32, i32) {
    %c0_i32 = arith.constant 0 : i32
    %c0_i32_0 = arith.constant 0 : i32
    %c0_i32_1 = arith.constant 0 : i32
    return %arg0, %c0_i32, %c0_i32_0 : i32, i32, i32
  }
}

module attributes {stable_mosaic.version = 11 : i64} {
  func.func @_matmul_res_ln_kernel(%arg0: i32, %arg1: i32, %arg2: memref<32x64xbf16, #tpu.memory_space<vmem>>, %arg3: memref<64x64xbf16, #tpu.memory_space<vmem>>, %arg4: memref<1x64xf32, #tpu.memory_space<vmem>>, %arg5: memref<32x64xf32, #tpu.memory_space<vmem>>, %arg6: memref<1x64xf32, #tpu.memory_space<vmem>>, %arg7: memref<1x64xf32, #tpu.memory_space<vmem>>, %arg8: memref<32x64xf32, #tpu.memory_space<vmem>>, %arg9: memref<32x64xf32, #tpu.memory_space<vmem>>) attributes {dimension_semantics = [#tpu.dimension_semantics<parallel>, #tpu.dimension_semantics<arbitrary>], iteration_bounds = array<i64: 1, 1>, scalar_prefetch = 0 : i64, scratch_operands = 1 : i64, tpu.core_type = #tpu.core_type<tc>, window_params = [{transform_indices = @transform_0, window_bounds = array<i64: 32, 64>}, {transform_indices = @transform_1, window_bounds = array<i64: 64, 64>}, {pipeline_mode = #tpu.pipeline_mode<synchronous>, transform_indices = @transform_2, window_bounds = array<i64: 1, 64>}, {transform_indices = @transform_3, window_bounds = array<i64: 32, 64>}, {pipeline_mode = #tpu.pipeline_mode<synchronous>, transform_indices = @transform_4, window_bounds = array<i64: 1, 64>}, {pipeline_mode = #tpu.pipeline_mode<synchronous>, transform_indices = @transform_5, window_bounds = array<i64: 1, 64>}, {transform_indices = @transform_6, window_bounds = array<i64: 32, 64>}]} {
    %c0_i32 = arith.constant 0 : i32
    %0 = arith.cmpi eq, %arg1, %c0_i32 : i32
    %1 = arith.extui %0 : i1 to i32
    %c0_i32_0 = arith.constant 0 : i32
    %2 = arith.cmpi ne, %1, %c0_i32_0 : i32
    scf.if %2 {
      %cst_10 = arith.constant 0.000000e+00 : f32
      %12 = vector.broadcast %cst_10 : f32 to vector<32x64xf32>
      %c0_11 = arith.constant 0 : index
      %c0_12 = arith.constant 0 : index
      %13 = vector.load %arg9[%c0_11, %c0_12] : memref<32x64xf32, #tpu.memory_space<vmem>>, vector<32x64xf32>
      tpu.vector_store %arg9[%c0_11, %c0_12], %12 {strides = array<i32>} : memref<32x64xf32, #tpu.memory_space<vmem>>, vector<32x64xf32>,
    } else {
    }
    %c0 = arith.constant 0 : index
    %c0_1 = arith.constant 0 : index
    %3 = vector.load %arg9[%c0, %c0_1] : memref<32x64xf32, #tpu.memory_space<vmem>>, vector<32x64xf32>
    %c0_2 = arith.constant 0 : index
    %c0_3 = arith.constant 0 : index
    %4 = vector.load %arg2[%c0_2, %c0_3] : memref<32x64xbf16, #tpu.memory_space<vmem>>, vector<32x64xbf16>
    %c0_4 = arith.constant 0 : index
    %c0_5 = arith.constant 0 : index
    %5 = vector.load %arg3[%c0_4, %c0_5] : memref<64x64xbf16, #tpu.memory_space<vmem>>, vector<64x64xbf16>
    %cst = arith.constant dense<0.000000e+00> : vector<32x64xf32>
    %6 = tpu.matmul %4, %5, %cst {dimension_numbers = #tpu.dot_dimension_numbers<[1], [0], [0], [1], [0, 0, 1, 1], [], []>} : vector<32x64xbf16>, vector<64x64xbf16>, vector<32x64xf32> -> vector<32x64xf32>
    %7 = arith.addf %3, %6 : vector<32x64xf32>
    %c0_6 = arith.constant 0 : index
    %c0_7 = arith.constant 0 : index
    %8 = vector.load %arg9[%c0_6, %c0_7] : memref<32x64xf32, #tpu.memory_space<vmem>>, vector<32x64xf32>
    tpu.vector_store %arg9[%c0_6, %c0_7], %7 {strides = array<i32>} : memref<32x64xf32, #tpu.memory_space<vmem>>, vector<32x64xf32>,
    %c0_i32_8 = arith.constant 0 : i32
    %9 = arith.cmpi eq, %arg1, %c0_i32_8 : i32
    %10 = arith.extui %9 : i1 to i32
    %c0_i32_9 = arith.constant 0 : i32
    %11 = arith.cmpi ne, %10, %c0_i32_9 : i32
    scf.if %11 {
      %c0_10 = arith.constant 0 : index
      %c0_11 = arith.constant 0 : index
      %12 = vector.load %arg9[%c0_10, %c0_11] : memref<32x64xf32, #tpu.memory_space<vmem>>, vector<32x64xf32>
      %c0_12 = arith.constant 0 : index
      %c0_13 = arith.constant 0 : index
      %13 = vector.load %arg4[%c0_12, %c0_13] : memref<1x64xf32, #tpu.memory_space<vmem>>, vector<1x64xf32>
      %14 = vector.broadcast %13 : vector<1x64xf32> to vector<32x64xf32>
      %15 = arith.addf %12, %14 : vector<32x64xf32>
      %c0_14 = arith.constant 0 : index
      %c0_15 = arith.constant 0 : index
      %16 = vector.load %arg5[%c0_14, %c0_15] : memref<32x64xf32, #tpu.memory_space<vmem>>, vector<32x64xf32>
      %17 = arith.addf %15, %16 : vector<32x64xf32>
      %cst_16 = arith.constant dense<0.000000e+00> : vector<32xf32>
      %18 = vector.multi_reduction <add>, %17, %cst_16 [1] : vector<32x64xf32> to vector<32xf32>
      %19 = vector.shape_cast %18 : vector<32xf32> to vector<32x1xf32>
      %cst_17 = arith.constant 6.400000e+01 : f32
      %20 = vector.broadcast %cst_17 : f32 to vector<32x1xf32>
      %21 = arith.divf %19, %20 : vector<32x1xf32>
      %22 = vector.broadcast %21 : vector<32x1xf32> to vector<32x64xf32>
      %23 = arith.subf %17, %22 : vector<32x64xf32>
      %24 = arith.mulf %23, %23 : vector<32x64xf32>
      %cst_18 = arith.constant dense<0.000000e+00> : vector<32xf32>
      %25 = vector.multi_reduction <add>, %24, %cst_18 [1] : vector<32x64xf32> to vector<32xf32>
      %26 = vector.shape_cast %25 : vector<32xf32> to vector<32x1xf32>
      %cst_19 = arith.constant 6.400000e+01 : f32
      %27 = vector.broadcast %cst_19 : f32 to vector<32x1xf32>
      %28 = arith.divf %26, %27 : vector<32x1xf32>
      %cst_20 = arith.constant 9.99999996E-13 : f32
      %29 = vector.broadcast %cst_20 : f32 to vector<32x1xf32>
      %30 = arith.addf %28, %29 : vector<32x1xf32>
      %31 = math.rsqrt %30 : vector<32x1xf32>
      %32 = vector.broadcast %31 : vector<32x1xf32> to vector<32x64xf32>
      %33 = arith.mulf %23, %32 : vector<32x64xf32>
      %c0_21 = arith.constant 0 : index
      %c0_22 = arith.constant 0 : index
      %34 = vector.load %arg6[%c0_21, %c0_22] : memref<1x64xf32, #tpu.memory_space<vmem>>, vector<1x64xf32>
      %35 = vector.broadcast %34 : vector<1x64xf32> to vector<32x64xf32>
      %36 = arith.mulf %33, %35 : vector<32x64xf32>
      %c0_23 = arith.constant 0 : index
      %c0_24 = arith.constant 0 : index
      %37 = vector.load %arg7[%c0_23, %c0_24] : memref<1x64xf32, #tpu.memory_space<vmem>>, vector<1x64xf32>
      %38 = vector.broadcast %37 : vector<1x64xf32> to vector<32x64xf32>
      %39 = arith.addf %36, %38 : vector<32x64xf32>
      %c0_25 = arith.constant 0 : index
      %c0_26 = arith.constant 0 : index
      %40 = vector.load %arg8[%c0_25, %c0_26] : memref<32x64xf32, #tpu.memory_space<vmem>>, vector<32x64xf32>
      tpu.vector_store %arg8[%c0_25, %c0_26], %39 {strides = array<i32>} : memref<32x64xf32, #tpu.memory_space<vmem>>, vector<32x64xf32>,
    } else {
    }
    return
  }
  func.func @transform_0(%arg0: i32, %arg1: i32) -> (i32, i32) {
    %c0_i32 = arith.constant 0 : i32
    return %arg0, %arg1 : i32, i32
  }
  func.func @transform_1(%arg0: i32, %arg1: i32) -> (i32, i32) {
    %c0_i32 = arith.constant 0 : i32
    %c0_i32_0 = arith.constant 0 : i32
    return %arg1, %c0_i32 : i32, i32
  }
  func.func @transform_2(%arg0: i32, %arg1: i32) -> (i32, i32) {
    %c0_i32 = arith.constant 0 : i32
    %c0_i32_0 = arith.constant 0 : i32
    %c0_i32_1 = arith.constant 0 : i32
    return %c0_i32, %c0_i32_0 : i32, i32
  }
  func.func @transform_3(%arg0: i32, %arg1: i32) -> (i32, i32) {
    %c0_i32 = arith.constant 0 : i32
    %c0_i32_0 = arith.constant 0 : i32
    return %arg0, %c0_i32 : i32, i32
  }
  func.func @transform_4(%arg0: i32, %arg1: i32) -> (i32, i32) {
    %c0_i32 = arith.constant 0 : i32
    %c0_i32_0 = arith.constant 0 : i32
    %c0_i32_1 = arith.constant 0 : i32
    return %c0_i32, %c0_i32_0 : i32, i32
  }
  func.func @transform_5(%arg0: i32, %arg1: i32) -> (i32, i32) {
    %c0_i32 = arith.constant 0 : i32
    %c0_i32_0 = arith.constant 0 : i32
    %c0_i32_1 = arith.constant 0 : i32
    return %c0_i32, %c0_i32_0 : i32, i32
  }
  func.func @transform_6(%arg0: i32, %arg1: i32) -> (i32, i32) {
    %c0_i32 = arith.constant 0 : i32
    %c0_i32_0 = arith.constant 0 : i32
    return %arg0, %c0_i32 : i32, i32
  }
}

module attributes {stable_mosaic.version = 11 : i64} {
  func.func @_matmul_kernel(%arg0: i32, %arg1: i32, %arg2: i32, %arg3: memref<32x64xf32, #tpu.memory_space<vmem>>, %arg4: memref<64x128xbf16, #tpu.memory_space<vmem>>, %arg5: memref<1x128xf32, #tpu.memory_space<vmem>>, %arg6: memref<32x128xbf16, #tpu.memory_space<vmem>>, %arg7: memref<32x128xf32, #tpu.memory_space<vmem>>) attributes {dimension_semantics = [#tpu.dimension_semantics<parallel>, #tpu.dimension_semantics<parallel>, #tpu.dimension_semantics<arbitrary>], iteration_bounds = array<i64: 1, 1, 1>, scalar_prefetch = 0 : i64, scratch_operands = 1 : i64, tpu.core_type = #tpu.core_type<tc>, window_params = [{transform_indices = @transform_0, window_bounds = array<i64: 32, 64>}, {transform_indices = @transform_1, window_bounds = array<i64: 64, 128>}, {transform_indices = @transform_2, window_bounds = array<i64: 1, 128>}, {transform_indices = @transform_3, window_bounds = array<i64: 32, 128>}]} {
    %c0_i32 = arith.constant 0 : i32
    %0 = arith.cmpi eq, %arg2, %c0_i32 : i32
    %1 = arith.extui %0 : i1 to i32
    %c0_i32_0 = arith.constant 0 : i32
    %2 = arith.cmpi ne, %1, %c0_i32_0 : i32
    scf.if %2 {
      %cst_10 = arith.constant 0.000000e+00 : f32
      %13 = vector.broadcast %cst_10 : f32 to vector<32x128xf32>
      %c0_11 = arith.constant 0 : index
      %c0_12 = arith.constant 0 : index
      %14 = vector.load %arg7[%c0_11, %c0_12] : memref<32x128xf32, #tpu.memory_space<vmem>>, vector<32x128xf32>
      tpu.vector_store %arg7[%c0_11, %c0_12], %13 {strides = array<i32>} : memref<32x128xf32, #tpu.memory_space<vmem>>, vector<32x128xf32>,
    } else {
    }
    %c0 = arith.constant 0 : index
    %c0_1 = arith.constant 0 : index
    %3 = vector.load %arg7[%c0, %c0_1] : memref<32x128xf32, #tpu.memory_space<vmem>>, vector<32x128xf32>
    %c0_2 = arith.constant 0 : index
    %c0_3 = arith.constant 0 : index
    %4 = vector.load %arg3[%c0_2, %c0_3] : memref<32x64xf32, #tpu.memory_space<vmem>>, vector<32x64xf32>
    %5 = arith.truncf %4 : vector<32x64xf32> to vector<32x64xbf16>
    %c0_4 = arith.constant 0 : index
    %c0_5 = arith.constant 0 : index
    %6 = vector.load %arg4[%c0_4, %c0_5] : memref<64x128xbf16, #tpu.memory_space<vmem>>, vector<64x128xbf16>
    %cst = arith.constant dense<0.000000e+00> : vector<32x128xf32>
    %7 = tpu.matmul %5, %6, %cst {dimension_numbers = #tpu.dot_dimension_numbers<[1], [0], [0], [1], [0, 0, 1, 1], [], []>} : vector<32x64xbf16>, vector<64x128xbf16>, vector<32x128xf32> -> vector<32x128xf32>
    %8 = arith.addf %3, %7 : vector<32x128xf32>
    %c0_6 = arith.constant 0 : index
    %c0_7 = arith.constant 0 : index
    %9 = vector.load %arg7[%c0_6, %c0_7] : memref<32x128xf32, #tpu.memory_space<vmem>>, vector<32x128xf32>
    tpu.vector_store %arg7[%c0_6, %c0_7], %8 {strides = array<i32>} : memref<32x128xf32, #tpu.memory_space<vmem>>, vector<32x128xf32>,
    %c0_i32_8 = arith.constant 0 : i32
    %10 = arith.cmpi eq, %arg2, %c0_i32_8 : i32
    %11 = arith.extui %10 : i1 to i32
    %c0_i32_9 = arith.constant 0 : i32
    %12 = arith.cmpi ne, %11, %c0_i32_9 : i32
    scf.if %12 {
      %c0_10 = arith.constant 0 : index
      %c0_11 = arith.constant 0 : index
      %13 = vector.load %arg7[%c0_10, %c0_11] : memref<32x128xf32, #tpu.memory_space<vmem>>, vector<32x128xf32>
      %c0_12 = arith.constant 0 : index
      %c0_13 = arith.constant 0 : index
      %14 = vector.load %arg5[%c0_12, %c0_13] : memref<1x128xf32, #tpu.memory_space<vmem>>, vector<1x128xf32>
      %15 = vector.broadcast %14 : vector<1x128xf32> to vector<32x128xf32>
      %16 = arith.addf %13, %15 : vector<32x128xf32>
      %cst_14 = arith.constant 5.000000e-01 : f32
      %17 = vector.broadcast %cst_14 : f32 to vector<32x128xf32>
      %18 = arith.mulf %17, %16 : vector<32x128xf32>
      %cst_15 = arith.constant 0.707106769 : f32
      %19 = vector.broadcast %cst_15 : f32 to vector<32x128xf32>
      %20 = arith.mulf %16, %19 : vector<32x128xf32>
      %21 = math.erf %20 : vector<32x128xf32>
      %cst_16 = arith.constant 1.000000e+00 : f32
      %22 = vector.broadcast %cst_16 : f32 to vector<32x128xf32>
      %23 = arith.addf %22, %21 : vector<32x128xf32>
      %24 = arith.mulf %18, %23 : vector<32x128xf32>
      %25 = arith.truncf %24 : vector<32x128xf32> to vector<32x128xbf16>
      %c0_17 = arith.constant 0 : index
      %c0_18 = arith.constant 0 : index
      %26 = vector.load %arg6[%c0_17, %c0_18] : memref<32x128xbf16, #tpu.memory_space<vmem>>, vector<32x128xbf16>
      tpu.vector_store %arg6[%c0_17, %c0_18], %25 {strides = array<i32>} : memref<32x128xbf16, #tpu.memory_space<vmem>>, vector<32x128xbf16>,
    } else {
    }
    return
  }
  func.func @transform_0(%arg0: i32, %arg1: i32, %arg2: i32) -> (i32, i32) {
    %c0_i32 = arith.constant 0 : i32
    return %arg0, %arg2 : i32, i32
  }
  func.func @transform_1(%arg0: i32, %arg1: i32, %arg2: i32) -> (i32, i32) {
    %c0_i32 = arith.constant 0 : i32
    return %arg2, %arg1 : i32, i32
  }
  func.func @transform_2(%arg0: i32, %arg1: i32, %arg2: i32) -> (i32, i32) {
    %c0_i32 = arith.constant 0 : i32
    %c0_i32_0 = arith.constant 0 : i32
    return %c0_i32, %arg1 : i32, i32
  }
  func.func @transform_3(%arg0: i32, %arg1: i32, %arg2: i32) -> (i32, i32) {
    %c0_i32 = arith.constant 0 : i32
    return %arg0, %arg1 : i32, i32
  }
}

module attributes {stable_mosaic.version = 11 : i64} {
  func.func @_matmul_res_ln_kernel(%arg0: i32, %arg1: i32, %arg2: memref<32x128xbf16, #tpu.memory_space<vmem>>, %arg3: memref<128x64xbf16, #tpu.memory_space<vmem>>, %arg4: memref<1x64xf32, #tpu.memory_space<vmem>>, %arg5: memref<32x64xf32, #tpu.memory_space<vmem>>, %arg6: memref<1x64xf32, #tpu.memory_space<vmem>>, %arg7: memref<1x64xf32, #tpu.memory_space<vmem>>, %arg8: memref<32x64xf32, #tpu.memory_space<vmem>>, %arg9: memref<32x64xf32, #tpu.memory_space<vmem>>) attributes {dimension_semantics = [#tpu.dimension_semantics<parallel>, #tpu.dimension_semantics<arbitrary>], iteration_bounds = array<i64: 1, 1>, scalar_prefetch = 0 : i64, scratch_operands = 1 : i64, tpu.core_type = #tpu.core_type<tc>, window_params = [{transform_indices = @transform_0, window_bounds = array<i64: 32, 128>}, {transform_indices = @transform_1, window_bounds = array<i64: 128, 64>}, {pipeline_mode = #tpu.pipeline_mode<synchronous>, transform_indices = @transform_2, window_bounds = array<i64: 1, 64>}, {transform_indices = @transform_3, window_bounds = array<i64: 32, 64>}, {pipeline_mode = #tpu.pipeline_mode<synchronous>, transform_indices = @transform_4, window_bounds = array<i64: 1, 64>}, {pipeline_mode = #tpu.pipeline_mode<synchronous>, transform_indices = @transform_5, window_bounds = array<i64: 1, 64>}, {transform_indices = @transform_6, window_bounds = array<i64: 32, 64>}]} {
    %c0_i32 = arith.constant 0 : i32
    %0 = arith.cmpi eq, %arg1, %c0_i32 : i32
    %1 = arith.extui %0 : i1 to i32
    %c0_i32_0 = arith.constant 0 : i32
    %2 = arith.cmpi ne, %1, %c0_i32_0 : i32
    scf.if %2 {
      %cst_10 = arith.constant 0.000000e+00 : f32
      %12 = vector.broadcast %cst_10 : f32 to vector<32x64xf32>
      %c0_11 = arith.constant 0 : index
      %c0_12 = arith.constant 0 : index
      %13 = vector.load %arg9[%c0_11, %c0_12] : memref<32x64xf32, #tpu.memory_space<vmem>>, vector<32x64xf32>
      tpu.vector_store %arg9[%c0_11, %c0_12], %12 {strides = array<i32>} : memref<32x64xf32, #tpu.memory_space<vmem>>, vector<32x64xf32>,
    } else {
    }
    %c0 = arith.constant 0 : index
    %c0_1 = arith.constant 0 : index
    %3 = vector.load %arg9[%c0, %c0_1] : memref<32x64xf32, #tpu.memory_space<vmem>>, vector<32x64xf32>
    %c0_2 = arith.constant 0 : index
    %c0_3 = arith.constant 0 : index
    %4 = vector.load %arg2[%c0_2, %c0_3] : memref<32x128xbf16, #tpu.memory_space<vmem>>, vector<32x128xbf16>
    %c0_4 = arith.constant 0 : index
    %c0_5 = arith.constant 0 : index
    %5 = vector.load %arg3[%c0_4, %c0_5] : memref<128x64xbf16, #tpu.memory_space<vmem>>, vector<128x64xbf16>
    %cst = arith.constant dense<0.000000e+00> : vector<32x64xf32>
    %6 = tpu.matmul %4, %5, %cst {dimension_numbers = #tpu.dot_dimension_numbers<[1], [0], [0], [1], [0, 0, 1, 1], [], []>} : vector<32x128xbf16>, vector<128x64xbf16>, vector<32x64xf32> -> vector<32x64xf32>
    %7 = arith.addf %3, %6 : vector<32x64xf32>
    %c0_6 = arith.constant 0 : index
    %c0_7 = arith.constant 0 : index
    %8 = vector.load %arg9[%c0_6, %c0_7] : memref<32x64xf32, #tpu.memory_space<vmem>>, vector<32x64xf32>
    tpu.vector_store %arg9[%c0_6, %c0_7], %7 {strides = array<i32>} : memref<32x64xf32, #tpu.memory_space<vmem>>, vector<32x64xf32>,
    %c0_i32_8 = arith.constant 0 : i32
    %9 = arith.cmpi eq, %arg1, %c0_i32_8 : i32
    %10 = arith.extui %9 : i1 to i32
    %c0_i32_9 = arith.constant 0 : i32
    %11 = arith.cmpi ne, %10, %c0_i32_9 : i32
    scf.if %11 {
      %c0_10 = arith.constant 0 : index
      %c0_11 = arith.constant 0 : index
      %12 = vector.load %arg9[%c0_10, %c0_11] : memref<32x64xf32, #tpu.memory_space<vmem>>, vector<32x64xf32>
      %c0_12 = arith.constant 0 : index
      %c0_13 = arith.constant 0 : index
      %13 = vector.load %arg4[%c0_12, %c0_13] : memref<1x64xf32, #tpu.memory_space<vmem>>, vector<1x64xf32>
      %14 = vector.broadcast %13 : vector<1x64xf32> to vector<32x64xf32>
      %15 = arith.addf %12, %14 : vector<32x64xf32>
      %c0_14 = arith.constant 0 : index
      %c0_15 = arith.constant 0 : index
      %16 = vector.load %arg5[%c0_14, %c0_15] : memref<32x64xf32, #tpu.memory_space<vmem>>, vector<32x64xf32>
      %17 = arith.addf %15, %16 : vector<32x64xf32>
      %cst_16 = arith.constant dense<0.000000e+00> : vector<32xf32>
      %18 = vector.multi_reduction <add>, %17, %cst_16 [1] : vector<32x64xf32> to vector<32xf32>
      %19 = vector.shape_cast %18 : vector<32xf32> to vector<32x1xf32>
      %cst_17 = arith.constant 6.400000e+01 : f32
      %20 = vector.broadcast %cst_17 : f32 to vector<32x1xf32>
      %21 = arith.divf %19, %20 : vector<32x1xf32>
      %22 = vector.broadcast %21 : vector<32x1xf32> to vector<32x64xf32>
      %23 = arith.subf %17, %22 : vector<32x64xf32>
      %24 = arith.mulf %23, %23 : vector<32x64xf32>
      %cst_18 = arith.constant dense<0.000000e+00> : vector<32xf32>
      %25 = vector.multi_reduction <add>, %24, %cst_18 [1] : vector<32x64xf32> to vector<32xf32>
      %26 = vector.shape_cast %25 : vector<32xf32> to vector<32x1xf32>
      %cst_19 = arith.constant 6.400000e+01 : f32
      %27 = vector.broadcast %cst_19 : f32 to vector<32x1xf32>
      %28 = arith.divf %26, %27 : vector<32x1xf32>
      %cst_20 = arith.constant 9.99999996E-13 : f32
      %29 = vector.broadcast %cst_20 : f32 to vector<32x1xf32>
      %30 = arith.addf %28, %29 : vector<32x1xf32>
      %31 = math.rsqrt %30 : vector<32x1xf32>
      %32 = vector.broadcast %31 : vector<32x1xf32> to vector<32x64xf32>
      %33 = arith.mulf %23, %32 : vector<32x64xf32>
      %c0_21 = arith.constant 0 : index
      %c0_22 = arith.constant 0 : index
      %34 = vector.load %arg6[%c0_21, %c0_22] : memref<1x64xf32, #tpu.memory_space<vmem>>, vector<1x64xf32>
      %35 = vector.broadcast %34 : vector<1x64xf32> to vector<32x64xf32>
      %36 = arith.mulf %33, %35 : vector<32x64xf32>
      %c0_23 = arith.constant 0 : index
      %c0_24 = arith.constant 0 : index
      %37 = vector.load %arg7[%c0_23, %c0_24] : memref<1x64xf32, #tpu.memory_space<vmem>>, vector<1x64xf32>
      %38 = vector.broadcast %37 : vector<1x64xf32> to vector<32x64xf32>
      %39 = arith.addf %36, %38 : vector<32x64xf32>
      %c0_25 = arith.constant 0 : index
      %c0_26 = arith.constant 0 : index
      %40 = vector.load %arg8[%c0_25, %c0_26] : memref<32x64xf32, #tpu.memory_space<vmem>>, vector<32x64xf32>
      tpu.vector_store %arg8[%c0_25, %c0_26], %39 {strides = array<i32>} : memref<32x64xf32, #tpu.memory_space<vmem>>, vector<32x64xf32>,
    } else {
    }
    return
  }
  func.func @transform_0(%arg0: i32, %arg1: i32) -> (i32, i32) {
    %c0_i32 = arith.constant 0 : i32
    return %arg0, %arg1 : i32, i32
  }
  func.func @transform_1(%arg0: i32, %arg1: i32) -> (i32, i32) {
    %c0_i32 = arith.constant 0 : i32
    %c0_i32_0 = arith.constant 0 : i32
    return %arg1, %c0_i32 : i32, i32
  }
  func.func @transform_2(%arg0: i32, %arg1: i32) -> (i32, i32) {
    %c0_i32 = arith.constant 0 : i32
    %c0_i32_0 = arith.constant 0 : i32
    %c0_i32_1 = arith.constant 0 : i32
    return %c0_i32, %c0_i32_0 : i32, i32
  }
  func.func @transform_3(%arg0: i32, %arg1: i32) -> (i32, i32) {
    %c0_i32 = arith.constant 0 : i32
    %c0_i32_0 = arith.constant 0 : i32
    return %arg0, %c0_i32 : i32, i32
  }
  func.func @transform_4(%arg0: i32, %arg1: i32) -> (i32, i32) {
    %c0_i32 = arith.constant 0 : i32
    %c0_i32_0 = arith.constant 0 : i32
    %c0_i32_1 = arith.constant 0 : i32
    return %c0_i32, %c0_i32_0 : i32, i32
  }
  func.func @transform_5(%arg0: i32, %arg1: i32) -> (i32, i32) {
    %c0_i32 = arith.constant 0 : i32
    %c0_i32_0 = arith.constant 0 : i32
    %c0_i32_1 = arith.constant 0 : i32
    return %c0_i32, %c0_i32_0 : i32, i32
  }
  func.func @transform_6(%arg0: i32, %arg1: i32) -> (i32, i32) {
    %c0_i32 = arith.constant 0 : i32
    %c0_i32_0 = arith.constant 0 : i32
    return %arg0, %c0_i32 : i32, i32
  }
}

</mosaic_0001>

<bundles_post_ra>
// kernel: entity_aware_layer.6
= control target key start
LH: loop header
LB: loop body
LE: loop exit
PB: predicated region body
PF: predicated region fallthrough
CT: control target
= control target key end

     0   :  { %8 = vsyncpa [#allocation4], 0  ;;  %s231_s15 = smov [#allocation3]   ;;  %s232_s17 = smov 128   ;;  %s272_s0 = inlined_call_operand.vmem [shape: f32[16,64], index: 0, kind: input, shape index: {}]   ;;  %s273_s1 = inlined_call_operand.hbm [shape: bf16[64,256], index: 1, kind: input, shape index: {}]   ;;  %s274_s2 = inlined_call_operand.vmem [shape: f32[1,256], index: 2, kind: input, shape index: {}]   ;;  %s275_s3 = inlined_call_operand.vmem [shape: bf16[16,256], index: 3, kind: output, shape index: {}]  }
   0x1   :  { %s15_s14 = sshll.u32 %s273_s1, 4  ;;  %s17_s16 = sshll.u32 %s231_s15, 4  ;;  %s16_s14 = int_to_ptr.hbm [resolvable:$true] %s15_s14  ;;  %s18_s16 = int_to_ptr.vmem [resolvable:$true] %s17_s16 }
   0x2   :  { %s233_s18 = smov 8  }
   0x3   :  { %23 = dma.hbm_to_vmem [thread:$0]  %s16_s14, 1024, %s18_s16, [#allocation4], %s232_s17, %s232_s17, %s233_s18  }
   0x4   :  { %229 = dma.done.wait [#allocation4], 1024  }
   0x5   :  { %230 = vsyncadd [#allocation4], 4294966272  ;;  %v186_v0 = vld [vmem:[#allocation3 + $0x30] sm:$0xf]  ;;  %v201_v1 = vld [vmem:[#allocation3 + $0x34] sm:$0xf0] }
   0x6   :  { %v200_v2 = vld [vmem:[#allocation3 + $0x34] sm:$0xf]  ;;  %v187_v3 = vor.u32 %v201_v1, %v186_v0  ;;  %v188_v4 = vld [vmem:[#allocation3 + $0x38] sm:$0xf0]  ;;  %v178_v5 = vld [vmem:[#allocation3 + $0x20] sm:$0xf] }
   0x7   :  { %v199_v6 = vld [vmem:[#allocation3 + $0x24] sm:$0xf0]  ;;  %v191_v7 = vor.u32 %v200_v2, %v188_v4  ;;  %v198_v8 = vld [vmem:[#allocation3 + $0x24] sm:$0xf]  ;;  %v180_v9 = vld [vmem:[#allocation3 + $0x28] sm:$0xf0] }
   0x8   :  { %102 = vmatpush.bf16.msra.mxu0 %v187_v3  ;;  %v179_v10 = vor.u32 %v199_v6, %v178_v5  ;;  %v183_v11 = vor.u32 %v198_v8, %v180_v9  ;;  %v170_v12 = vld [vmem:[#allocation3 + $0x10] sm:$0xf]  ;;  %v197_v13 = vld [vmem:[#allocation3 + $0x14] sm:$0xf0]  ;;  %v196_v14 = vld [vmem:[#allocation3 + $0x14] sm:$0xf] }
   0x9   :  { %116 = vmatpush.bf16.msra.mxu1 %v191_v7  ;;  %v172_v15 = vld [vmem:[#allocation3 + $0x18] sm:$0xf0]  ;;  %v171_v16 = vor.u32 %v197_v13, %v170_v12  ;;  %v162_v18 = vld [vmem:[#allocation3] sm:$0xf]  ;;  %v195_v19 = vld [vmem:[#allocation3 + $0x4] sm:$0xf0] }
   0xa   :  { %v175_v17 = vor.u32 %v196_v14, %v172_v15  ;;  %v194_v20 = vld [vmem:[#allocation3 + $0x4] sm:$0xf]  ;;  %v164_v21 = vld [vmem:[#allocation3 + $0x8] sm:$0xf0]  ;;  %v163_v22 = vor.u32 %v195_v19, %v162_v18  ;;  %vm94_vm0 = vcmask 523264  }
   0xb   :  { %v43_v23 = vld [vmem:[%s272_s0] sm:$0xff]  ;;  %v44_v24 = vld [vmem:[%s272_s0 + $0x8] sm:$0xff]  ;;  %v167_v25 = vor.u32 %v194_v20, %v164_v21 }
   0xc   :  { %103 = vmatpush.bf16.msra.mxu0 %v179_v10  ;;  %v45_v26 = vpack.c.bf16 %v44_v24, %v43_v23  ;;  %v141_v27 = vld [vmem:[%s274_s2] sm:$0x3] }
   0xd   :  { %117 = vmatpush.bf16.msra.mxu1 %v183_v11  ;;  %v143_v28 = vperm.slane %v141_v27, 0  ;;  %v144_v29 = vperm.slane %v141_v27, 1 }
  0x10   :  { %104 = vmatpush.bf16.msra.mxu0 %v171_v16 }
  0x11   :  { %118 = vmatpush.bf16.msra.mxu1 %v175_v17 }
  0x14   :  { %105 = vmatpush.bf16.msra.mxu0 %v163_v22 }
  0x15   :  { %119 = vmatpush.bf16.msra.mxu1 %v167_v25 }
  0x17   :  { %192 = vmatmul.msk.bf16.vlgmr.msra.gmra.mxu0 %vm94_vm0, %v45_v26 }
  0x18   :  { %193 = vmatmul.msk.bf16.vlgmr.msra.gmra.mxu1 %vm94_vm0, %v45_v26 }
  0x94   :  { %v107_v30 = vpop.f32.mrf.mxu0 }
  0x95   :  { %v147_v31 = vadd.f32 %v143_v28, %v107_v30  ;;  %v121_v32 = vpop.f32.mrf.mxu1 }
  0x96   :  { %v148_v33 = vadd.f32 %v144_v29, %v121_v32 }
  0x98   :  { %v151_v34 = vpack.c.bf16 %v148_v33, %v147_v31 }
  0x9a   :  { %153 = vst [vmem:[%s275_s3] sm:$0xff] %v151_v34 }
  0x9c   :  { %v109_v35 = vpop.f32.mrf.mxu0 }
  0x9d   :  { %v149_v36 = vadd.f32 %v143_v28, %v109_v35  ;;  %v123_v37 = vpop.f32.mrf.mxu1 }
  0x9e   :  { %v150_v38 = vadd.f32 %v144_v29, %v123_v37 }
  0xa0   :  { %v152_v39 = vpack.c.bf16 %v150_v38, %v149_v36 }
  0xa2   :  { %154 = vst [vmem:[%s275_s3 + $0x8] sm:$0xff] %v152_v39 }
  0xa3   :  { %159 = vsyncpa [#allocation4], 1 }

// kernel: entity_aware_layer.7
= control target key start
LH: loop header
LB: loop body
LE: loop exit
PB: predicated region body
PF: predicated region fallthrough
CT: control target
= control target key end

     0   :  { %8 = vsyncpa [#allocation4], 0  ;;  %s314_s0 = inlined_call_operand.hbm [shape: f32[16,64], index: 0, kind: input, shape index: {}]   ;;  %s315_s1 = inlined_call_operand.hbm [shape: bf16[64,256], index: 1, kind: input, shape index: {}]   ;;  %s316_s2 = inlined_call_operand.vmem [shape: f32[1,256], index: 2, kind: input, shape index: {}]   ;;  %s317_s3 = inlined_call_operand.vmem [shape: bf16[16,256], index: 3, kind: output, shape index: {}]  }
   0x1   :  { %s14_s14 = sshll.u32 %s314_s0, 4  ;;  %s15_s14 = int_to_ptr.hbm [resolvable:$true] %s14_s14 }
   0x2   :  { %9 = vsyncpa [#allocation6], 0  ;;  %s275_s15 = smov [#allocation3]   ;;  %s27_s19 = sshll.u32 %s315_s1, 4  ;;  %s28_s19 = int_to_ptr.hbm [resolvable:$true] %s27_s19 }
   0x3   :  { %s16_s16 = sshll.u32 %s275_s15, 4  ;;  %s276_s20 = smov 128   ;;  %s17_s16 = int_to_ptr.vmem [resolvable:$true] %s16_s16 }
   0x4   :  { %s277_s21 = smov 8   ;;  %s278_s22 = smov [#allocation5]  }
   0x5   :  { %22 = dma.hbm_to_vmem [thread:$0]  %s15_s14, 256, %s17_s16, [#allocation4], %s276_s20, %s276_s20, %s277_s21  }
   0x6   :  { %s29_s23 = sshll.u32 %s278_s22, 4  ;;  %s30_s23 = int_to_ptr.vmem [resolvable:$true] %s29_s23 }
   0x7   :  { %35 = dma.hbm_to_vmem [thread:$0]  %s28_s19, 1024, %s30_s23, [#allocation6], %s276_s20, %s276_s20, %s277_s21  }
   0x8   :  { %271 = dma.done.wait [#allocation4], 256  }
   0x9   :  { %272 = vsyncadd [#allocation4], 4294967040 }
   0xa   :  { %273 = dma.done.wait [#allocation6], 1024  }
   0xb   :  { %274 = vsyncadd [#allocation6], 4294966272  ;;  %v203_v0 = vld [vmem:[#allocation5 + $0x30] sm:$0xf]  ;;  %v218_v1 = vld [vmem:[#allocation5 + $0x34] sm:$0xf0] }
   0xc   :  { %v217_v2 = vld [vmem:[#allocation5 + $0x34] sm:$0xf]  ;;  %v204_v3 = vor.u32 %v218_v1, %v203_v0  ;;  %v205_v4 = vld [vmem:[#allocation5 + $0x38] sm:$0xf0]  ;;  %v195_v5 = vld [vmem:[#allocation5 + $0x20] sm:$0xf] }
   0xd   :  { %v216_v6 = vld [vmem:[#allocation5 + $0x24] sm:$0xf0]  ;;  %v208_v7 = vor.u32 %v217_v2, %v205_v4  ;;  %v215_v8 = vld [vmem:[#allocation5 + $0x24] sm:$0xf]  ;;  %v197_v9 = vld [vmem:[#allocation5 + $0x28] sm:$0xf0] }
   0xe   :  { %118 = vmatpush.bf16.msra.mxu0 %v204_v3  ;;  %v196_v10 = vor.u32 %v216_v6, %v195_v5  ;;  %v200_v11 = vor.u32 %v215_v8, %v197_v9  ;;  %v187_v12 = vld [vmem:[#allocation5 + $0x10] sm:$0xf]  ;;  %v214_v13 = vld [vmem:[#allocation5 + $0x14] sm:$0xf0]  ;;  %v213_v14 = vld [vmem:[#allocation5 + $0x14] sm:$0xf] }
   0xf   :  { %132 = vmatpush.bf16.msra.mxu1 %v208_v7  ;;  %v189_v15 = vld [vmem:[#allocation5 + $0x18] sm:$0xf0]  ;;  %v188_v16 = vor.u32 %v214_v13, %v187_v12  ;;  %v179_v18 = vld [vmem:[#allocation5] sm:$0xf]  ;;  %v212_v19 = vld [vmem:[#allocation5 + $0x4] sm:$0xf0] }
  0x10   :  { %v192_v17 = vor.u32 %v213_v14, %v189_v15  ;;  %v211_v20 = vld [vmem:[#allocation5 + $0x4] sm:$0xf]  ;;  %v181_v21 = vld [vmem:[#allocation5 + $0x8] sm:$0xf0]  ;;  %v180_v22 = vor.u32 %v212_v19, %v179_v18  ;;  %v59_v23 = vld [vmem:[#allocation3] sm:$0xff]  ;;  %vm110_vm0 = vcmask 523264  }
  0x11   :  { %v60_v24 = vld [vmem:[#allocation3 + $0x8] sm:$0xff]  ;;  %v184_v25 = vor.u32 %v211_v20, %v181_v21  ;;  %v157_v27 = vld [vmem:[%s316_s2] sm:$0x3] }
  0x12   :  { %119 = vmatpush.bf16.msra.mxu0 %v196_v10  ;;  %v61_v26 = vpack.c.bf16 %v60_v24, %v59_v23  ;;  %v159_v28 = vperm.slane %v157_v27, 0  ;;  %v160_v29 = vperm.slane %v157_v27, 1 }
  0x13   :  { %133 = vmatpush.bf16.msra.mxu1 %v200_v11 }
  0x16   :  { %120 = vmatpush.bf16.msra.mxu0 %v188_v16 }
  0x17   :  { %134 = vmatpush.bf16.msra.mxu1 %v192_v17 }
  0x1a   :  { %121 = vmatpush.bf16.msra.mxu0 %v180_v22 }
  0x1b   :  { %135 = vmatpush.bf16.msra.mxu1 %v184_v25 }
  0x1d   :  { %209 = vmatmul.msk.bf16.vlgmr.msra.gmra.mxu0 %vm110_vm0, %v61_v26 }
  0x1e   :  { %210 = vmatmul.msk.bf16.vlgmr.msra.gmra.mxu1 %vm110_vm0, %v61_v26 }
  0x9a   :  { %v123_v30 = vpop.f32.mrf.mxu0 }
  0x9b   :  { %v163_v31 = vadd.f32 %v159_v28, %v123_v30  ;;  %v137_v32 = vpop.f32.mrf.mxu1 }
  0x9c   :  { %v164_v33 = vadd.f32 %v160_v29, %v137_v32 }
  0x9e   :  { %v167_v34 = vpack.c.bf16 %v164_v33, %v163_v31 }
  0xa0   :  { %169 = vst [vmem:[%s317_s3] sm:$0xff] %v167_v34 }
  0xa2   :  { %v125_v35 = vpop.f32.mrf.mxu0 }
  0xa3   :  { %v165_v36 = vadd.f32 %v159_v28, %v125_v35  ;;  %v139_v37 = vpop.f32.mrf.mxu1 }
  0xa4   :  { %v166_v38 = vadd.f32 %v160_v29, %v139_v37 }
  0xa6   :  { %v168_v39 = vpack.c.bf16 %v166_v38, %v165_v36 }
  0xa8   :  { %170 = vst [vmem:[%s317_s3 + $0x8] sm:$0xff] %v168_v39 }
  0xa9   :  { %175 = vsyncpa [#allocation4], 1 }
  0xaa   :  { %176 = vsyncpa [#allocation6], 1 }

// kernel: entity_aware_layer.8
= control target key start
LH: loop header
LB: loop body
LE: loop exit
PB: predicated region body
PF: predicated region fallthrough
CT: control target
= control target key end

     0   :  { %s823_s12 = smov 0   ;;  %s944_s0 = inlined_call_operand.vmem [shape: bf16[2,8,256], index: 0, kind: input, shape index: {}]   ;;  %s945_s1 = inlined_call_operand.vmem [shape: bf16[2,8,256], index: 1, kind: input, shape index: {}]   ;;  %s946_s2 = inlined_call_operand.vmem [shape: f32[2,1,16], index: 2, kind: input, shape index: {}]   ;;  %s947_s3 = inlined_call_operand.vmem [shape: bf16[2,16,64], index: 3, kind: output, shape index: {}]  }
   0x1 LB: > { %s722_s13 = sadd.s32 4294967295, %s797_s12   ;;  %p726_p0 = scmp.ge.s32.totalorder %s797_s12, 1  ;;  %s797_s12 = sphi %s823_s12, %s13_s12  }
   0x2   : > { %p155_p1 = scmp.lt.s32.totalorder %s797_s12, 3 }
   0x4   : > { %p156_p2 = pnand %p726_p0, %p155_p1 }
   0x5   : > { %p187_p3 = scmp.lt.s32.totalorder (!%p156_p2), %s722_s13, 1  ;;  %s799_s24 = smov (!%p156_p2), 64  }
   0x6   : > { %159 = sbr.rel (%p156_p2) target bundleno = 958 (0x3be), region = 32  ;;  %s800_s25 = smov (!%p156_p2), 120  }
   0x7   : > { %s801_s26 = smov (!%p156_p2), 96   ;;  %s802_s27 = smov (!%p156_p2), 32  }
   0xb   : > { %s949_s13 = smov (!%p187_p3, %s722_s13), 1  ;;  %vm215_vm0 = vcmask 261120   ;;  %vm264_vm1 = vcmask 64512   ;;  %vm293_vm2 = vcmask 1043456   ;;  %vm333_vm3 = vcmask 257024  }
   0xc   : > { %s831_s14 = sshll.u32 %s949_s13, 3  ;;  %s199_s17 = scalar_lea.vmem %s946_s2, %s949_s13  ;;  %vm452_vm4 = vcmask 519424  }
   0xd   : > { %s191_s20 = scalar_lea.vmem %s944_s0, %s831_s14  ;;  %s196_s23 = scalar_lea.vmem %s945_s1, %s831_s14  ;;  %v856_v10 = vld [vmem:[%s199_s17] ss:$0 sm:$0xff] }
   0xe   : > { %v206_v0 = vld [vmem:[%s191_s20] sm:$0xff]  ;;  %s204_s30 = scalar_lea.vmem %s947_s3, %s831_s14 }
   0xf   : > { %v844_v1 = vld [vmem:[%s196_s23] sm:$0xff]  ;;  %v235_v2 = vunpack.c.l.b16 %v206_v0  ;;  %v213_v3 = vunpack.c.h.b16 %v206_v0 }
  0x10   : > { %v240_v4 = vunpack.c.h.b16 %v844_v1  ;;  %v470_v21 = vunpack.c.l.b16 %v844_v1 }
  0x11   : > { %v236_v5 = vpack.c.b16 %v235_v2, %v235_v2  ;;  %v214_v6 = vpack.c.b16 %v213_v3, %v213_v3 }
  0x12   : > { %v241_v7 = vpack.c.b16 %v240_v4, %v240_v4  ;;  %v471_v22 = vpack.c.b16 %v470_v21, %v470_v21 }
  0x13   : > { %237 = vrot.lane.b32.xlu0 %v236_v5, %s799_s24  ;;  %v220_v8 = vsel %vm215_vm0, %v214_v6, 0 }
  0x14   : > { %v850_v9 = vsel %vm215_vm0, %v241_v7, 0  ;;  %288 = vrot.lane.b32.xlu2 %v241_v7, %s799_s24  ;;  %229 = vmatpush.bf16.xpose.msra.mxu0 %v220_v8 }
  0x15   : > { %258 = vmatpush.bf16.xpose.msra.mxu1 %v850_v9 }
  0x1b   : > { %733 = vmatmul.msk.bf16.vlgmr.msra.gmra.mxu0 %vm215_vm0, %v206_v0  ;;  %242 = vrot.lane.b32.xlu0 %v856_v10, %s800_s25 }
  0x1c   : > { %310 = vrot.lane.b32.xlu2 %v214_v6, %s799_s24 }
  0x23   : > { %337 = vrot.lane.b32.xlu0 %v214_v6, %s801_s26 }
  0x24   : > { %335 = vrot.lane.b32.xlu2 %v236_v5, %s801_s26 }
  0x2b   : > { %358 = vrot.lane.b32.xlu0 %v236_v5, %s802_s27 }
  0x2c   : > { %472 = vrot.lane.b32.xlu2 %v471_v22, %s799_s24 }
  0x33   : > { %548 = vrot.lane.b32.xlu0 %v471_v22, %s801_s26 }
  0x34   : > { %566 = vrot.lane.b32.xlu2 %v471_v22, %s802_s27 }
  0x6e   : > { %v289_v23 = vpop.permute.xlu2 %288 }
  0x6f   : > { %v295_v24 = vsel %vm293_vm2, %v289_v23, 0 }
  0x70   : > { %304 = vmatpush.bf16.msra.mxu2 %v295_v24 }
  0x76   : > { %v311_v25 = vpop.permute.xlu2 %310 }
  0x77   : > { %v316_v26 = vsel %vm293_vm2, %v311_v25, 0 }
  0x78   : > { %325 = vmatpush.bf16.msra.mxu3 %v316_v26 }
  0x7e   : > { %v336_v42 = vpop.permute.xlu2 %335 }
  0x85   : > { %v238_v11 = vpop.permute.xlu0 %237 }
  0x86   : > { %734 = vmatmul.msk.bf16.vlgmr.msra.gmra.mxu1 %vm215_vm0, %v238_v11  ;;  %v473_v48 = vpop.permute.xlu2 %472 }
  0x8d   : > { %v863_v16 = vpop.permute.xlu0 %242 }
  0x8e   : > { %v567_v50 = vpop.permute.xlu2 %566 }
  0x95   : > { %v338_v27 = vpop.permute.xlu0 %337 }
  0x96   : > { %v343_v28 = vsel %vm215_vm0, %v338_v27, 0 }
  0x97   : > { %352 = vmatpush.bf16.xpose.msrb.mxu2 %v343_v28 }
  0x98   : > { %v231_v12 = vpop.f32.mrf.mxu0 }
  0x99   : > { %v232_v13 = vadd.f32 %v856_v10, %v231_v12 }
  0x9b   : > { %v265_v14 = vsel %vm264_vm1, %v232_v13, -inf }
  0x9c   : > { %266 = vmax.xlane.f32.xlu1 %v265_v14 }
  0x9d   : > { %v359_v43 = vpop.permute.xlu0 %358 }
  0xa0   : > { %v233_v15 = vpop.f32.mrf.mxu0 }
  0xa5   : > { %v549_v49 = vpop.permute.xlu0 %548 }
 0x103   : > { %v260_v17 = vpop.f32.mrf.mxu1 }
 0x104   : > { %v261_v18 = vadd.f32 %v260_v17, %v863_v16 }
 0x106   : > { %v268_v19 = vsel %vm264_vm1, %v261_v18, -inf }
 0x107   : > { %269 = vmax.xlane.f32.xlu1 %v268_v19 }
 0x10b   : > { %v262_v20 = vpop.f32.mrf.mxu1 }
 0x10f   : > { %v267_v29 = vpop.xlane.xlu1 %266 }
 0x120   : > { %360 = vrot.lane.b32.xlu1 %v241_v7, %s801_s26 }
 0x128   : > { %404 = vrot.lane.b32.xlu1 %v241_v7, %s802_s27 }
 0x130   : > { %425 = vrot.lane.b32.xlu1 %v214_v6, %s802_s27 }
 0x17a   : > { %v270_v30 = vpop.xlane.xlu1 %269 }
 0x17b   : > { %v271_v31 = vmax.f32 %v267_v29, %v270_v30 }
 0x17d   : > { %v272_v32 = vsub.f32 %v232_v13, %v271_v31  ;;  %v275_v33 = vsub.f32 %v261_v18, %v271_v31 }
 0x17f   : > { %v273_v34 = vmul.f32 1.442695, %v272_v32  ;;  %v276_v35 = vmul.f32 1.442695, %v275_v33 }
 0x181   : > { %767 = vpow2.f32 %v273_v34 }
 0x182   : > { %769 = vpow2.f32 %v276_v35 }
 0x187   : > { %v875_v36 = vpop.eup %767 }
 0x188   : > { %v877_v37 = vpop.eup %769  ;;  %v286_v38 = vpack.c.bf16 %v875_v36, %v875_v36 }
 0x189   : > { %v287_v39 = vpack.c.bf16 %v877_v37, %v877_v37 }
 0x18a   : > { %736 = vmatmul.msk.bf16.vlgmr.msra.gmra.mxu3 %vm264_vm1, %v286_v38  ;;  %v278_v38 = vsel %vm264_vm1, %v875_v36, 0.0 }
 0x18b   : > { %735 = vmatmul.msk.bf16.vlgmr.msra.gmra.mxu2 %vm264_vm1, %v287_v39 }
 0x18c   : > { %464 = vmatpush.bf16.xpose.msra.mxu2 %v220_v8 }
 0x192   : > { %v361_v40 = vpop.permute.xlu1 %360 }
 0x193   : > { %v366_v41 = vsel %vm215_vm0, %v361_v40, 0 }
 0x194   : > { %375 = vmatpush.bf16.xpose.msrb.mxu3 %v366_v41 }
 0x19a   : > { %v405_v44 = vpop.permute.xlu1 %404 }
 0x19b   : > { %737 = vmatmul.msk.bf16.vlgmr.msrb.gmra.mxu2 %vm215_vm0, %v336_v42  ;;  %738 = vmatmul.msk.bf16.vlgmr.msrb.gmra.mxu3 %vm215_vm0, %v359_v43  ;;  %v890_v45 = vsel %vm293_vm2, %v405_v44, 0 }
 0x19c   : > { %484 = vmatpush.bf16.xpose.msra.mxu3 %v850_v9  ;;  %560 = vmatpush.bf16.xpose.msrb.mxu2 %v343_v28 }
 0x19d   : > { %419 = vmatpush.bf16.msrb.mxu0 %v890_v45 }
 0x1a1   : > { %523 = vmatpush.bf16.msra.mxu0 %v295_v24 }
 0x1a2   : > { %v426_v46 = vpop.permute.xlu1 %425 }
 0x1a3   : > { %v894_v47 = vsel %vm293_vm2, %v426_v46, 0 }
 0x1a4   : > { %578 = vmatpush.bf16.xpose.msrb.mxu3 %v366_v41  ;;  %440 = vmatpush.bf16.msrb.mxu1 %v894_v47 }
 0x1a8   : > { %539 = vmatpush.bf16.msra.mxu1 %v316_v26 }
 0x1ab   : > { %741 = vmatmul.msk.bf16.vlgmr.msra.gmra.mxu2 %vm215_vm0, %v844_v1  ;;  %742 = vmatmul.msk.bf16.vlgmr.msra.gmra.mxu3 %vm215_vm0, %v473_v48 }
 0x1bb   : > { %745 = vmatmul.msk.bf16.vlgmr.msrb.gmra.mxu2 %vm215_vm0, %v549_v49  ;;  %746 = vmatmul.msk.bf16.vlgmr.msrb.gmra.mxu3 %vm215_vm0, %v567_v50 }
 0x20d   : > { %v327_v51 = vpop.f32.mrf.mxu3 }
 0x20e   : > { %v306_v52 = vpop.f32.mrf.mxu2 }
 0x20f   : > { %v902_v53 = vadd.f32 %v327_v51, %v306_v52 }
 0x215   : > { %v329_v54 = vpop.f32.mrf.mxu3 }
 0x216   : > { %v308_v55 = vpop.f32.mrf.mxu2 }
 0x21e   : > { %v354_v56 = vpop.f32.mrf.mxu2  ;;  %v377_v57 = vpop.f32.mrf.mxu3 }
 0x21f   : > { %v355_v58 = vadd.f32 %v856_v10, %v354_v56  ;;  %v378_v59 = vadd.f32 %v377_v57, %v863_v16  ;;  %v281_v57 = vsel %vm264_vm1, %v877_v37, 0.0 }
 0x221   : > { %v381_v60 = vsel %vm264_vm1, %v355_v58, -inf  ;;  %v384_v61 = vsel %vm264_vm1, %v378_v59, -inf }
 0x222   : > { %382 = vmax.xlane.f32.xlu0 %v381_v60  ;;  %385 = vmax.xlane.f32.xlu2 %v384_v61 }
 0x226   : > { %v356_v62 = vpop.f32.mrf.mxu2  ;;  %v379_v63 = vpop.f32.mrf.mxu3 }
 0x22e   : > { %v466_v0 = vpop.f32.mrf.mxu2  ;;  %v486_v1 = vpop.f32.mrf.mxu3 }
 0x22f   : > { %v467_v2 = vadd.f32 %v856_v10, %v466_v0  ;;  %v487_v3 = vadd.f32 %v486_v1, %v863_v16 }
 0x231   : > { %v490_v4 = vsel %vm264_vm1, %v467_v2, -inf  ;;  %v493_v5 = vsel %vm264_vm1, %v487_v3, -inf }
 0x232   : > { %491 = vmax.xlane.f32.xlu1 %v490_v4  ;;  %494 = vmax.xlane.f32.xlu2 %v493_v5 }
 0x236   : > { %v468_v6 = vpop.f32.mrf.mxu2  ;;  %v488_v7 = vpop.f32.mrf.mxu3 }
 0x23e   : > { %v562_v8 = vpop.f32.mrf.mxu2  ;;  %v580_v9 = vpop.f32.mrf.mxu3 }
 0x23f   : > { %v563_v11 = vadd.f32 %v856_v10, %v562_v8  ;;  %v581_v12 = vadd.f32 %v580_v9, %v863_v16 }
 0x241   : > { %v584_v13 = vsel %vm264_vm1, %v563_v11, -inf  ;;  %v587_v14 = vsel %vm264_vm1, %v581_v12, -inf }
 0x242   : > { %585 = vmax.xlane.f32.xlu0 %v584_v13  ;;  %588 = vmax.xlane.f32.xlu2 %v587_v14 }
 0x246   : > { %v564_v15 = vpop.f32.mrf.mxu2  ;;  %v582_v17 = vpop.f32.mrf.mxu3 }
 0x295   : > { %v383_v18 = vpop.xlane.xlu0 %382  ;;  %v386_v19 = vpop.xlane.xlu2 %385 }
 0x296   : > { %v387_v20 = vmax.f32 %v383_v18, %v386_v19 }
 0x298   : > { %v388_v21 = vsub.f32 %v355_v58, %v387_v20  ;;  %v391_v22 = vsub.f32 %v378_v59, %v387_v20 }
 0x29a   : > { %v389_v23 = vmul.f32 1.442695, %v388_v21  ;;  %v392_v24 = vmul.f32 1.442695, %v391_v22 }
 0x29c   : > { %771 = vpow2.f32 %v389_v23 }
 0x29d   : > { %773 = vpow2.f32 %v392_v24 }
 0x2a2   : > { %v772_v10 = vpop.eup %771 }
 0x2a3   : > { %v774_v25 = vpop.eup %773  ;;  %v394_v16 = vsel %vm264_vm1, %v772_v10, 0.0  ;;  %v402_v26 = vpack.c.bf16 %v772_v10, %v772_v10 }
 0x2a4   : > { %v397_v27 = vsel %vm264_vm1, %v774_v25, 0.0  ;;  %395 = vadd.xlane.f32.xlu0 %v394_v16  ;;  %v403_v28 = vpack.c.bf16 %v774_v25, %v774_v25 }
 0x2a5   : > { %398 = vadd.xlane.f32.xlu2 %v397_v27  ;;  %v495_v29 = vpop.xlane.xlu2 %494  ;;  %740 = vmatmul.msk.bf16.vlgmr.msrb.gmra.mxu1 %vm264_vm1, %v402_v26  ;;  %v492_v30 = vpop.xlane.xlu1 %491 }
 0x2a6   : > { %739 = vmatmul.msk.bf16.vlgmr.msrb.gmra.mxu0 %vm264_vm1, %v403_v28  ;;  %633 = vmatpush.bf16.msrb.mxu1 %v894_v47  ;;  %v496_v31 = vmax.f32 %v492_v30, %v495_v29 }
 0x2a7   : > { %617 = vmatpush.bf16.msrb.mxu0 %v890_v45 }
 0x2a8   : > { %v497_v32 = vsub.f32 %v467_v2, %v496_v31  ;;  %v500_v33 = vsub.f32 %v487_v3, %v496_v31 }
 0x2aa   : > { %v498_v34 = vmul.f32 1.442695, %v497_v32  ;;  %v501_v35 = vmul.f32 1.442695, %v500_v33 }
 0x2ac   : > { %775 = vpow2.f32 %v498_v34 }
 0x2ad   : > { %777 = vpow2.f32 %v501_v35  ;;  %279 = vadd.xlane.f32.xlu2 %v278_v38 }
 0x2b2   : > { %v776_v39 = vpop.eup %775 }
 0x2b3   : > { %v778_v40 = vpop.eup %777  ;;  %v511_v41 = vpack.c.bf16 %v776_v39, %v776_v39  ;;  %v503_v58 = vsel %vm264_vm1, %v776_v39, 0.0 }
 0x2b4   : > { %v512_v42 = vpack.c.bf16 %v778_v40, %v778_v40  ;;  %v506_v43 = vsel %vm264_vm1, %v778_v40, 0.0 }
 0x2b5   : > { %507 = vadd.xlane.f32.xlu2 %v506_v43  ;;  %v586_v44 = vpop.xlane.xlu0 %585  ;;  %v589_v46 = vpop.xlane.xlu2 %588  ;;  %744 = vmatmul.msk.bf16.vlgmr.msra.gmra.mxu1 %vm264_vm1, %v511_v41 }
 0x2b6   : > { %v590_v45 = vmax.f32 %v586_v44, %v589_v46  ;;  %743 = vmatmul.msk.bf16.vlgmr.msra.gmra.mxu0 %vm264_vm1, %v512_v42 }
 0x2b8   : > { %v591_v47 = vsub.f32 %v563_v11, %v590_v45  ;;  %v594_v48 = vsub.f32 %v581_v12, %v590_v45 }
 0x2ba   : > { %v592_v49 = vmul.f32 1.442695, %v591_v47  ;;  %v595_v36 = vmul.f32 1.442695, %v594_v48 }
 0x2bc   : > { %779 = vpow2.f32 %v592_v49 }
 0x2bd   : > { %781 = vpow2.f32 %v595_v36 }
 0x2c2   : > { %v780_v50 = vpop.eup %779 }
 0x2c3   : > { %v782_v51 = vpop.eup %781  ;;  %v605_v52 = vpack.c.bf16 %v780_v50, %v780_v50  ;;  %v597_v54 = vsel %vm264_vm1, %v780_v50, 0.0 }
 0x2c4   : > { %v606_v55 = vpack.c.bf16 %v782_v51, %v782_v51  ;;  %v600_v56 = vsel %vm264_vm1, %v782_v51, 0.0  ;;  %598 = vadd.xlane.f32.xlu0 %v597_v54 }
 0x2c5   : > { %601 = vadd.xlane.f32.xlu1 %v600_v56  ;;  %748 = vmatmul.msk.bf16.vlgmr.msrb.gmra.mxu1 %vm264_vm1, %v605_v52 }
 0x2c6   : > { %747 = vmatmul.msk.bf16.vlgmr.msrb.gmra.mxu0 %vm264_vm1, %v606_v55 }
 0x2cc   : > { %282 = vadd.xlane.f32.xlu0 %v281_v57 }
 0x2cd   : > { %504 = vadd.xlane.f32.xlu1 %v503_v58 }
 0x317   : > { %v396_v59 = vpop.xlane.xlu0 %395 }
 0x318   : > { %v399_v60 = vpop.xlane.xlu2 %398 }
 0x319   : > { %v400_v61 = vadd.f32 %v399_v60, %v396_v59 }
 0x31b   : > { %783 = vrcp.f32 %v400_v61 }
 0x320   : > { %v280_v7 = vpop.xlane.xlu2 %279 }
 0x321   : > { %v784_v1 = vpop.eup %783 }
 0x322   : > { %v442_v62 = vpop.f32.mrf.mxu1 }
 0x323   : > { %v421_v63 = vpop.f32.mrf.mxu0 }
 0x324   : > { %v443_v0 = vadd.f32 %v442_v62, %v421_v63 }
 0x326   : > { %v446_v2 = vmul.f32 %v784_v1, %v443_v0 }
 0x328   : > { %v447_v3 = vpack.c.bf16 %v446_v2, %v446_v2  ;;  %v508_v15 = vpop.xlane.xlu2 %507 }
 0x32a   : > { %449 = vrot.lane.b32.xlu0 %v447_v3, %s802_s27  ;;  %v444_v4 = vpop.f32.mrf.mxu1 }
 0x32b   : > { %v423_v5 = vpop.f32.mrf.mxu0 }
 0x332   : > { %v541_v6 = vpop.f32.mrf.mxu1 }
 0x333   : > { %v525_v37 = vpop.f32.mrf.mxu0 }
 0x334   : > { %v542_v25 = vadd.f32 %v541_v6, %v525_v37 }
 0x337   : > { %v599_v8 = vpop.xlane.xlu0 %598 }
 0x338   : > { %v602_v9 = vpop.xlane.xlu1 %601 }
 0x339   : > { %v603_v12 = vadd.f32 %v602_v9, %v599_v8 }
 0x33a   : > { %v543_v11 = vpop.f32.mrf.mxu1 }
 0x33b   : > { %v527_v13 = vpop.f32.mrf.mxu0  ;;  %785 = vrcp.f32 %v603_v12 }
 0x33f   : > { %v283_v14 = vpop.xlane.xlu0 %282 }
 0x340   : > { %v284_v17 = vadd.f32 %v283_v14, %v280_v7  ;;  %v505_v18 = vpop.xlane.xlu1 %504 }
 0x341   : > { %v509_v19 = vadd.f32 %v508_v15, %v505_v18  ;;  %v786_v23 = vpop.eup %785 }
 0x342   : > { %787 = vrcp.f32 %v284_v17  ;;  %v635_v20 = vpop.f32.mrf.mxu1 }
 0x343   : > { %789 = vrcp.f32 %v509_v19  ;;  %v619_v21 = vpop.f32.mrf.mxu0 }
 0x344   : > { %v636_v22 = vadd.f32 %v635_v20, %v619_v21 }
 0x346   : > { %v639_v24 = vmul.f32 %v786_v23, %v636_v22 }
 0x348   : > { %v788_v10 = vpop.eup %787  ;;  %v640_v16 = vpack.c.bf16 %v639_v24, %v639_v24 }
 0x349   : > { %v790_v26 = vpop.eup %789  ;;  %v331_v27 = vmul.f32 %v788_v10, %v902_v53 }
 0x34a   : > { %v545_v28 = vmul.f32 %v790_v26, %v542_v25  ;;  %642 = vrot.lane.b32.xlu1 %v640_v16, %s802_s27  ;;  %v637_v29 = vpop.f32.mrf.mxu1 }
 0x34b   : > { %v332_v30 = vpack.c.bf16 %v331_v27, %v331_v27  ;;  %v621_v31 = vpop.f32.mrf.mxu0 }
 0x34c   : > { %v546_v32 = vpack.c.bf16 %v545_v28, %v545_v28 }
 0x34d   : > { %334 = vst.msk [vmem:[%s204_s30] sm:$0xf] %vm333_vm3, %v332_v30 }
 0x34e   : > { %547 = vst.msk [vmem:[%s204_s30 + $0x4] sm:$0xf] %vm333_vm3, %v546_v32 }
 0x39c   : > { %v450_v33 = vpop.permute.xlu0 %449 }
 0x39d   : > { %453 = vst.msk [vmem:[%s204_s30] sm:$0xf] %vm452_vm4, %v450_v33 }
 0x3bc   : > { %v643_v34 = vpop.permute.xlu1 %642 }
 0x3bd   : > { %645 = vst.msk [vmem:[%s204_s30 + $0x4] sm:$0xf] %vm452_vm4, %v643_v34 }
 0x3be PF: > { %s13_s12 = sadd.s32 1, %s797_s12  }
 0x3bf   : > { %p10_p4 = scmp.ge.s32.totalorder %s13_s12, 4  }
 0x3c1   :  { %12 = sbr.rel (!%p10_p4) target bundleno = 1 (0x1), region = 68 }

// kernel: entity_aware_layer.9
= control target key start
LH: loop header
LB: loop body
LE: loop exit
PB: predicated region body
PF: predicated region fallthrough
CT: control target
= control target key end

     0   :  { %vm28_vm0 = vcmask 523264   ;;  %v310_v1 = vmov 0.0   ;;  %v311_v40 = vmov 64.0   ;;  %s435_s1 = inlined_call_operand.vmem [shape: bf16[64,64], index: 1, kind: input, shape index: {}]   ;;  %s436_s0 = inlined_call_operand.vmem [shape: bf16[32,64], index: 0, kind: input, shape index: {}]   ;;  %s437_s2 = inlined_call_operand.vmem [shape: f32[1,64], index: 2, kind: input, shape index: {}]   ;;  %s438_s3 = inlined_call_operand.vmem [shape: f32[32,64], index: 3, kind: input, shape index: {}]   ;;  %s439_s4 = inlined_call_operand.vmem [shape: f32[1,64], index: 4, kind: input, shape index: {}]   ;;  %s440_s5 = inlined_call_operand.vmem [shape: f32[1,64], index: 5, kind: input, shape index: {}]   ;;  %s441_s6 = inlined_call_operand.vmem [shape: f32[32,64], index: 6, kind: output, shape index: {}]  }
   0x1   :  { %v290_v0 = vld [vmem:[%s435_s1 + $0x18] sm:$0xff]  ;;  %29 = vst.msk [vmem:[#allocation2] sm:$0xff] %vm28_vm0, %v310_v1  ;;  %v289_v2 = vld [vmem:[%s435_s1 + $0x10] sm:$0xff]  ;;  %v288_v3 = vld [vmem:[%s435_s1 + $0x8] sm:$0xff]  ;;  %300 = vrcp.f32 %v311_v40 }
   0x2   :  { %30 = vst.msk [vmem:[#allocation2 + $0x8] sm:$0xff] %vm28_vm0, %v310_v1  ;;  %94 = vmatpush.bf16.msra.mxu0 %v290_v0  ;;  %291 = vmatpush.bf16.msra.mxu1 %v290_v0  ;;  %v287_v4 = vld [vmem:[%s435_s1] sm:$0xff]  ;;  %v286_v6 = vld [vmem:[%s436_s0 + $0x8] sm:$0xff]  ;;  %v134_v23 = vld [vmem:[%s438_s3 + $0x10] sm:$0xff] }
   0x3   :  { %31 = vst.msk [vmem:[#allocation2 + $0x10] sm:$0xff] %vm28_vm0, %v310_v1  ;;  %v285_v5 = vld [vmem:[%s436_s0] sm:$0xff]  ;;  %v133_v31 = vld [vmem:[%s438_s3 + $0x8] sm:$0xff]  ;;  %v135_v33 = vld [vmem:[%s438_s3 + $0x18] sm:$0xff] }
   0x4   :  { %32 = vst.msk [vmem:[#allocation2 + $0x18] sm:$0xff] %vm28_vm0, %v310_v1  ;;  %v297_v15 = vld [vmem:[%s437_s2] ss:$0 sm:$0xff] }
   0x5   :  { %v132_v21 = vld [vmem:[%s438_s3] sm:$0xff] }
   0x6   :  { %95 = vmatpush.bf16.msra.mxu0 %v289_v2  ;;  %292 = vmatpush.bf16.msra.mxu1 %v289_v2 }
   0x7   :  { %v301_v41 = vpop.eup %300 }
   0x8   :  { %v33_v7 = vld [vmem:[#allocation2] sm:$0xff]  ;;  %v153_v42 = vmul.f32 64.0, %v301_v41  ;;  %vm157_vm1 = vweird.f32 %v301_v41 }
   0x9   :  { %v34_v13 = vld [vmem:[#allocation2 + $0x8] sm:$0xff] }
   0xa   :  { %96 = vmatpush.bf16.msra.mxu0 %v288_v3  ;;  %293 = vmatpush.bf16.msra.mxu1 %v288_v3  ;;  %v35_v8 = vld [vmem:[#allocation2 + $0x10] sm:$0xff]  ;;  %v154_v43 = vsub.f32 1.0, %v153_v42 }
   0xb   :  { %v36_v14 = vld [vmem:[#allocation2 + $0x18] sm:$0xff] }
   0xc   :  { %v155_v44 = vmul.f32 %v301_v41, %v154_v43 }
   0xe   :  { %97 = vmatpush.bf16.msra.mxu0 %v287_v4  ;;  %294 = vmatpush.bf16.msra.mxu1 %v287_v4  ;;  %v156_v45 = vadd.f32 %v301_v41, %v155_v44 }
  0x10   :  { %v158_v46 = vsel %vm157_vm1, %v301_v41, %v156_v45 }
  0x11   :  { %283 = vmatmul.msk.bf16.vlgmr.msra.gmra.mxu0 %vm28_vm0, %v285_v5  ;;  %284 = vmatmul.msk.bf16.vlgmr.msra.gmra.mxu1 %vm28_vm0, %v286_v6 }
  0x8e   :  { %v99_v9 = vpop.f32.mrf.mxu0  ;;  %v104_v10 = vpop.f32.mrf.mxu1 }
  0x8f   :  { %v109_v11 = vadd.f32 %v99_v9, %v33_v7  ;;  %v111_v12 = vadd.f32 %v104_v10, %v35_v8 }
  0x91   :  { %113 = vst.msk [vmem:[#allocation2] sm:$0xff] %vm28_vm0, %v109_v11 }
  0x92   :  { %115 = vst.msk [vmem:[#allocation2 + $0x10] sm:$0xff] %vm28_vm0, %v111_v12 }
  0x96   :  { %v101_v16 = vpop.f32.mrf.mxu0  ;;  %v106_v17 = vpop.f32.mrf.mxu1 }
  0x97   :  { %v110_v18 = vadd.f32 %v101_v16, %v34_v13  ;;  %v112_v19 = vadd.f32 %v106_v17, %v36_v14 }
  0x98   :  { %v120_v20 = vld [vmem:[#allocation2] sm:$0xff] }
  0x99   :  { %114 = vst.msk [vmem:[#allocation2 + $0x8] sm:$0xff] %vm28_vm0, %v110_v18  ;;  %v122_v22 = vld [vmem:[#allocation2 + $0x10] sm:$0xff]  ;;  %v128_v24 = vadd.f32 %v297_v15, %v120_v20 }
  0x9a   :  { %116 = vst.msk [vmem:[#allocation2 + $0x18] sm:$0xff] %vm28_vm0, %v112_v19  ;;  %v130_v25 = vadd.f32 %v297_v15, %v122_v22 }
  0x9b   :  { %v136_v26 = vadd.f32 %v132_v21, %v128_v24 }
  0x9c   :  { %v138_v27 = vadd.f32 %v134_v23, %v130_v25 }
  0x9d   :  { %v140_v28 = vsel %vm28_vm0, %v136_v26, 0.0 }
  0x9e   :  { %v146_v29 = vsel %vm28_vm0, %v138_v27, 0.0  ;;  %141 = vadd.xlane.f32.xlu0 %v140_v28 }
  0x9f   :  { %147 = vadd.xlane.f32.xlu1 %v146_v29  ;;  %v298_v29 = vld [vmem:[%s439_s4] ss:$0 sm:$0xff] }
  0xa0   :  { %v121_v30 = vld [vmem:[#allocation2 + $0x8] sm:$0xff] }
  0xa1   :  { %v123_v32 = vld [vmem:[#allocation2 + $0x18] sm:$0xff]  ;;  %v129_v34 = vadd.f32 %v297_v15, %v121_v30 }
  0xa2   :  { %v131_v35 = vadd.f32 %v297_v15, %v123_v32 }
  0xa3   :  { %v137_v36 = vadd.f32 %v133_v31, %v129_v34  ;;  %v299_v34 = vld [vmem:[%s440_s5] ss:$0 sm:$0xff] }
  0xa4   :  { %v139_v37 = vadd.f32 %v135_v33, %v131_v35 }
  0xa5   :  { %v143_v38 = vsel %vm28_vm0, %v137_v36, 0.0 }
  0xa6   :  { %v149_v39 = vsel %vm28_vm0, %v139_v37, 0.0  ;;  %144 = vadd.xlane.f32.xlu0 %v143_v38 }
  0xa7   :  { %150 = vadd.xlane.f32.xlu1 %v149_v39 }
 0x111   :  { %v142_v47 = vpop.xlane.xlu0 %141 }
 0x112   :  { %v148_v48 = vpop.xlane.xlu1 %147  ;;  %v159_v49 = vmul.f32 %v158_v46, %v142_v47 }
 0x113   :  { %v161_v50 = vmul.f32 %v158_v46, %v148_v48 }
 0x114   :  { %v163_v51 = vsub.f32 %v136_v26, %v159_v49 }
 0x115   :  { %v394_v52 = vsub.f32 %v138_v27, %v161_v50 }
 0x116   :  { %v167_v53 = vmul.f32 %v163_v51, %v163_v51 }
 0x117   :  { %v169_v54 = vmul.f32 %v394_v52, %v394_v52 }
 0x118   :  { %v171_v55 = vsel %vm28_vm0, %v167_v53, 0.0 }
 0x119   :  { %172 = vadd.xlane.f32.xlu2 %v171_v55  ;;  %v177_v56 = vsel %vm28_vm0, %v169_v54, 0.0  ;;  %v145_v57 = vpop.xlane.xlu0 %144 }
 0x11a   :  { %v151_v58 = vpop.xlane.xlu1 %150  ;;  %178 = vadd.xlane.f32.xlu0 %v177_v56  ;;  %v160_v59 = vmul.f32 %v158_v46, %v145_v57 }
 0x11b   :  { %v162_v60 = vmul.f32 %v158_v46, %v151_v58 }
 0x11c   :  { %v400_v61 = vsub.f32 %v137_v36, %v160_v59 }
 0x11d   :  { %v402_v62 = vsub.f32 %v139_v37, %v162_v60 }
 0x11e   :  { %v168_v63 = vmul.f32 %v400_v61, %v400_v61 }
 0x11f   :  { %v170_v0 = vmul.f32 %v402_v62, %v402_v62 }
 0x120   :  { %v174_v1 = vsel %vm28_vm0, %v168_v63, 0.0 }
 0x121   :  { %v180_v2 = vsel %vm28_vm0, %v170_v0, 0.0  ;;  %175 = vadd.xlane.f32.xlu2 %v174_v1 }
 0x122   :  { %181 = vadd.xlane.f32.xlu1 %v180_v2 }
 0x18c   :  { %v173_v3 = vpop.xlane.xlu2 %172 }
 0x18d   :  { %v183_v4 = vmul.f32 %v173_v3, %v158_v46  ;;  %v179_v5 = vpop.xlane.xlu0 %178 }
 0x18e   :  { %v185_v6 = vmul.f32 %v179_v5, %v158_v46 }
 0x18f   :  { %v187_v7 = vadd.f32 1e-12, %v183_v4 }
 0x190   :  { %v189_v8 = vadd.f32 1e-12, %v185_v6 }
 0x191   :  { %302 = vrsqrt.f32 %v187_v7  ;;  %vm197_vm4 = vweird.f32 %v187_v7 }
 0x192   :  { %304 = vrsqrt.f32 %v189_v8  ;;  %vm217_vm6 = vweird.f32 %v189_v8 }
 0x194   :  { %v176_v9 = vpop.xlane.xlu2 %175 }
 0x195   :  { %v182_v10 = vpop.xlane.xlu1 %181  ;;  %v184_v11 = vmul.f32 %v176_v9, %v158_v46 }
 0x196   :  { %v186_v12 = vmul.f32 %v182_v10, %v158_v46 }
 0x197   :  { %v303_v13 = vpop.eup %302  ;;  %v188_v14 = vadd.f32 1e-12, %v184_v11 }
 0x198   :  { %v305_v15 = vpop.eup %304  ;;  %v192_v16 = vmul.f32 %v303_v13, %v187_v7  ;;  %v190_v17 = vadd.f32 1e-12, %v186_v12  ;;  %vm198_vm2 = vweird.f32 %v303_v13 }
 0x199   :  { %v212_v18 = vmul.f32 %v305_v15, %v189_v8  ;;  %306 = vrsqrt.f32 %v188_v14  ;;  %vm218_vm3 = vweird.f32 %v305_v15  ;;  %vm199_vm5 = vmor %vm197_vm4, %vm198_vm2  ;;  %vm207_vm10 = vweird.f32 %v188_v14 }
 0x19a   :  { %v193_v19 = vmul.f32 %v303_v13, %v192_v16  ;;  %308 = vrsqrt.f32 %v190_v17  ;;  %vm219_vm7 = vmor %vm217_vm6, %vm218_vm3  ;;  %vm227_vm11 = vweird.f32 %v190_v17 }
 0x19b   :  { %v213_v20 = vmul.f32 %v305_v15, %v212_v18 }
 0x19c   :  { %v194_v21 = vmul.f32 0.5, %v193_v19 }
 0x19d   :  { %v214_v22 = vmul.f32 0.5, %v213_v20 }
 0x19e   :  { %v195_v23 = vsub.f32 1.5, %v194_v21 }
 0x19f   :  { %v307_v24 = vpop.eup %306  ;;  %v215_v25 = vsub.f32 1.5, %v214_v22 }
 0x1a0   :  { %v309_v26 = vpop.eup %308  ;;  %v196_v27 = vmul.f32 %v303_v13, %v195_v23  ;;  %v202_v28 = vmul.f32 %v307_v24, %v188_v14  ;;  %vm208_vm8 = vweird.f32 %v307_v24 }
 0x1a1   :  { %v216_v30 = vmul.f32 %v305_v15, %v215_v25  ;;  %v222_v31 = vmul.f32 %v309_v26, %v190_v17  ;;  %vm228_vm9 = vweird.f32 %v309_v26  ;;  %vm209_vm12 = vmor %vm207_vm10, %vm208_vm8 }
 0x1a2   :  { %v200_v32 = vsel %vm199_vm5, %v303_v13, %v196_v27  ;;  %v203_v33 = vmul.f32 %v307_v24, %v202_v28  ;;  %vm229_vm13 = vmor %vm227_vm11, %vm228_vm9 }
 0x1a3   :  { %v231_v35 = vmul.f32 %v200_v32, %v163_v51  ;;  %v220_v36 = vsel %vm219_vm7, %v305_v15, %v216_v30  ;;  %v223_v37 = vmul.f32 %v309_v26, %v222_v31 }
 0x1a4   :  { %v233_v38 = vmul.f32 %v220_v36, %v394_v52  ;;  %v204_v39 = vmul.f32 0.5, %v203_v33 }
 0x1a5   :  { %v239_v40 = vmul.f32 %v298_v29, %v231_v35  ;;  %v224_v41 = vmul.f32 0.5, %v223_v37 }
 0x1a6   :  { %v241_v42 = vmul.f32 %v298_v29, %v233_v38  ;;  %v205_v43 = vsub.f32 1.5, %v204_v39 }
 0x1a7   :  { %v247_v44 = vadd.f32 %v299_v34, %v239_v40  ;;  %v225_v45 = vsub.f32 1.5, %v224_v41 }
 0x1a8   :  { %v249_v46 = vadd.f32 %v299_v34, %v241_v42  ;;  %v206_v47 = vmul.f32 %v307_v24, %v205_v43 }
 0x1a9   :  { %251 = vst.msk [vmem:[%s441_s6] sm:$0xff] %vm28_vm0, %v247_v44  ;;  %v226_v48 = vmul.f32 %v309_v26, %v225_v45 }
 0x1aa   :  { %253 = vst.msk [vmem:[%s441_s6 + $0x10] sm:$0xff] %vm28_vm0, %v249_v46  ;;  %v210_v49 = vsel %vm209_vm12, %v307_v24, %v206_v47 }
 0x1ab   :  { %v230_v50 = vsel %vm229_vm13, %v309_v26, %v226_v48  ;;  %v232_v51 = vmul.f32 %v210_v49, %v400_v61 }
 0x1ac   :  { %v234_v52 = vmul.f32 %v230_v50, %v402_v62 }
 0x1ad   :  { %v240_v53 = vmul.f32 %v298_v29, %v232_v51 }
 0x1ae   :  { %v242_v54 = vmul.f32 %v298_v29, %v234_v52 }
 0x1af   :  { %v248_v55 = vadd.f32 %v299_v34, %v240_v53 }
 0x1b0   :  { %v250_v56 = vadd.f32 %v299_v34, %v242_v54 }
 0x1b1   :  { %252 = vst.msk [vmem:[%s441_s6 + $0x8] sm:$0xff] %vm28_vm0, %v248_v55 }
 0x1b2   :  { %254 = vst.msk [vmem:[%s441_s6 + $0x18] sm:$0xff] %vm28_vm0, %v250_v56 }

// kernel: entity_aware_layer.10
= control target key start
LH: loop header
LB: loop body
LE: loop exit
PB: predicated region body
PF: predicated region fallthrough
CT: control target
= control target key end

     0   :  { %8 = vsyncpa [#allocation4], 0  ;;  %s398_s15 = smov [#allocation3]   ;;  %s399_s17 = smov 64   ;;  %s556_s0 = inlined_call_operand.vmem [shape: f32[32,64], index: 0, kind: input, shape index: {}]   ;;  %s557_s1 = inlined_call_operand.hbm [shape: bf16[64,128], index: 1, kind: input, shape index: {}]   ;;  %s558_s2 = inlined_call_operand.vmem [shape: f32[1,128], index: 2, kind: input, shape index: {}]   ;;  %s559_s3 = inlined_call_operand.vmem [shape: bf16[32,128], index: 3, kind: output, shape index: {}]  }
   0x1   :  { %s15_s14 = sshll.u32 %s557_s1, 4  ;;  %s17_s16 = sshll.u32 %s398_s15, 4  ;;  %s16_s14 = int_to_ptr.hbm [resolvable:$true] %s15_s14  ;;  %s18_s16 = int_to_ptr.vmem [resolvable:$true] %s17_s16 }
   0x2   :  { %s400_s18 = smov 4  }
   0x3   :  { %23 = dma.hbm_to_vmem [thread:$0]  %s16_s14, 512, %s18_s16, [#allocation4], %s399_s17, %s399_s17, %s400_s18  }
   0x4   :  { %396 = dma.done.wait [#allocation4], 512  }
   0x5   :  { %397 = vsyncadd [#allocation4], 4294966784  ;;  %v344_v0 = vld [vmem:[#allocation3 + $0x18] sm:$0xff]  ;;  %v343_v1 = vld [vmem:[#allocation3 + $0x10] sm:$0xff]  ;;  %vm81_vm0 = vcmask 523264  }
   0x6   :  { %92 = vmatpush.bf16.msra.mxu0 %v344_v0  ;;  %356 = vmatpush.bf16.msra.mxu1 %v344_v0  ;;  %v342_v2 = vld [vmem:[#allocation3 + $0x8] sm:$0xff]  ;;  %v341_v3 = vld [vmem:[#allocation3] sm:$0xff]  ;;  %v45_v6 = vld [vmem:[%s556_s0 + $0x10] sm:$0xff] }
   0x7   :  { %v43_v4 = vld [vmem:[%s556_s0] sm:$0xff]  ;;  %v44_v5 = vld [vmem:[%s556_s0 + $0x8] sm:$0xff]  ;;  %v46_v7 = vld [vmem:[%s556_s0 + $0x18] sm:$0xff] }
   0x8   :  { %v47_v8 = vpack.c.bf16 %v44_v5, %v43_v4  ;;  %v48_v9 = vpack.c.bf16 %v46_v7, %v45_v6  ;;  %v363_v10 = vld [vmem:[%s558_s2] ss:$0 sm:$0xff] }
   0xa   :  { %93 = vmatpush.bf16.msra.mxu0 %v343_v1  ;;  %357 = vmatpush.bf16.msra.mxu1 %v343_v1 }
   0xe   :  { %94 = vmatpush.bf16.msra.mxu0 %v342_v2  ;;  %358 = vmatpush.bf16.msra.mxu1 %v342_v2 }
  0x12   :  { %95 = vmatpush.bf16.msra.mxu0 %v341_v3  ;;  %359 = vmatpush.bf16.msra.mxu1 %v341_v3 }
  0x15   :  { %335 = vmatmul.msk.bf16.vlgmr.msra.gmra.mxu0 %vm81_vm0, %v47_v8  ;;  %336 = vmatmul.msk.bf16.vlgmr.msra.gmra.mxu1 %vm81_vm0, %v48_v9 }
  0x92   :  { %v97_v11 = vpop.f32.mrf.mxu0  ;;  %v102_v12 = vpop.f32.mrf.mxu1 }
  0x93   :  { %v439_v13 = vadd.f32 %v363_v10, %v97_v11  ;;  %v441_v14 = vadd.f32 %v363_v10, %v102_v12 }
  0x95   :  { %v444_v15 = vmul.f32 0.70710677, %v439_v13  ;;  %v447_v16 = vmul.f32 0.70710677, %v441_v14 }
  0x97   :  { %v138_v17 = vmul.f32 %v444_v15, %v444_v15  ;;  %v218_v18 = vmul.f32 %v447_v16, %v447_v16 }
  0x99   :  { %v453_v19 = vmin.f32 %v138_v17, 16.0  ;;  %v455_v20 = vmin.f32 %v218_v18, 16.0 }
  0x9a   :  { %v99_v21 = vpop.f32.mrf.mxu0  ;;  %v104_v22 = vpop.f32.mrf.mxu1 }
  0x9b   :  { %v140_v23 = vmul.f32 2.1237322e-06, %v453_v19  ;;  %v151_v24 = vmul.f32 3.8918573e-05, %v453_v19  ;;  %v459_v25 = vadd.f32 %v363_v10, %v99_v21  ;;  %v231_v26 = vmul.f32 3.8918573e-05, %v455_v20 }
  0x9c   :  { %v462_v27 = vadd.f32 %v363_v10, %v104_v22  ;;  %v220_v33 = vmul.f32 2.1237322e-06, %v455_v20 }
  0x9d   :  { %v141_v28 = vadd.f32 0.00028619796, %v140_v23  ;;  %v152_v29 = vadd.f32 0.001143296, %v151_v24  ;;  %v232_v30 = vadd.f32 0.001143296, %v231_v26 }
  0x9e   :  { %v465_v31 = vmul.f32 0.70710677, %v459_v25  ;;  %v470_v34 = vmul.f32 0.70710677, %v462_v27  ;;  %v221_v43 = vadd.f32 0.00028619796, %v220_v33 }
  0x9f   :  { %v153_v32 = vmul.f32 %v152_v29, %v453_v19  ;;  %v233_v35 = vmul.f32 %v232_v30, %v455_v20  ;;  %v142_v37 = vmul.f32 %v141_v28, %v453_v19 }
  0xa0   :  { %v178_v36 = vmul.f32 %v465_v31, %v465_v31  ;;  %v258_v39 = vmul.f32 %v470_v34, %v470_v34  ;;  %v222_v54 = vmul.f32 %v221_v43, %v455_v20 }
  0xa1   :  { %v154_v38 = vadd.f32 0.014752088, %v153_v32  ;;  %v234_v40 = vadd.f32 0.014752088, %v233_v35  ;;  %v143_v48 = vadd.f32 0.0036580483, %v142_v37 }
  0xa2   :  { %v478_v41 = vmin.f32 %v178_v36, 16.0  ;;  %v481_v44 = vmin.f32 %v258_v39, 16.0  ;;  %v223_v1 = vadd.f32 0.0036580483, %v222_v54 }
  0xa3   :  { %v155_v42 = vmul.f32 %v154_v38, %v453_v19  ;;  %v235_v45 = vmul.f32 %v234_v40, %v455_v20  ;;  %v144_v60 = vmul.f32 %v143_v48, %v453_v19 }
  0xa4   :  { %v180_v46 = vmul.f32 2.1237322e-06, %v478_v41  ;;  %v191_v47 = vmul.f32 3.8918573e-05, %v478_v41  ;;  %v260_v55 = vmul.f32 2.1237322e-06, %v481_v44  ;;  %v224_v17 = vmul.f32 %v223_v1, %v455_v20 }
  0xa5   :  { %v156_v49 = vadd.f32 0.112945676, %v155_v42  ;;  %v236_v50 = vadd.f32 0.112945676, %v235_v45  ;;  %v271_v59 = vmul.f32 3.8918573e-05, %v481_v44 }
  0xa6   :  { %v181_v51 = vadd.f32 0.00028619796, %v180_v46  ;;  %v192_v52 = vadd.f32 0.001143296, %v191_v47  ;;  %v261_v5 = vadd.f32 0.00028619796, %v260_v55 }
  0xa7   :  { %v157_v53 = vmul.f32 %v156_v49, %v453_v19  ;;  %v237_v56 = vmul.f32 %v236_v50, %v455_v20  ;;  %v272_v6 = vadd.f32 0.001143296, %v271_v59  ;;  %v145_v7 = vadd.f32 0.05243302, %v144_v60 }
  0xa8   :  { %v182_v57 = vmul.f32 %v181_v51, %v478_v41  ;;  %v193_v58 = vmul.f32 %v192_v52, %v478_v41  ;;  %v262_v18 = vmul.f32 %v261_v5, %v481_v44  ;;  %v225_v26 = vadd.f32 0.05243302, %v224_v17 }
  0xa9   :  { %v158_v61 = vadd.f32 0.4994258, %v157_v53  ;;  %v238_v62 = vadd.f32 0.4994258, %v237_v56  ;;  %v273_v11 = vmul.f32 %v272_v6, %v481_v44  ;;  %v146_v21 = vmul.f32 %v145_v7, %v453_v19 }
  0xaa   :  { %v194_v63 = vadd.f32 0.014752088, %v193_v58  ;;  %v183_v2 = vadd.f32 0.0036580483, %v182_v57  ;;  %v263_v29 = vadd.f32 0.0036580483, %v262_v18  ;;  %v226_v43 = vmul.f32 %v225_v26, %v455_v20 }
  0xab   :  { %v159_v0 = vmul.f32 %v158_v61, %v453_v19  ;;  %v239_v3 = vmul.f32 %v238_v62, %v455_v20  ;;  %v274_v23 = vadd.f32 0.014752088, %v273_v11  ;;  %v147_v33 = vadd.f32 0.18741608, %v146_v21 }
  0xac   :  { %v195_v4 = vmul.f32 %v194_v63, %v478_v41  ;;  %v184_v12 = vmul.f32 %v183_v2, %v478_v41  ;;  %v264_v46 = vmul.f32 %v263_v29, %v481_v44  ;;  %v227_v55 = vadd.f32 0.18741608, %v226_v43 }
  0xad   :  { %v160_v8 = vadd.f32 1.0, %v159_v0  ;;  %v497_v9 = vadd.f32 1.0, %v239_v3  ;;  %v275_v30 = vmul.f32 %v274_v23, %v481_v44  ;;  %v148_v47 = vmul.f32 %v147_v33, %v453_v19 }
  0xae   :  { %v196_v10 = vadd.f32 0.112945676, %v195_v4  ;;  %v185_v24 = vadd.f32 0.05243302, %v184_v12  ;;  %v265_v56 = vadd.f32 0.05243302, %v264_v46  ;;  %v228_v3 = vmul.f32 %v227_v55, %v455_v20 }
  0xaf   :  { %364 = vrcp.f32 %v160_v8  ;;  %v276_v40 = vadd.f32 0.112945676, %v275_v30  ;;  %v172_v54 = vand.u32 2147483648, %v160_v8  ;;  %v149_v57 = vadd.f32 1.1283791, %v148_v47 }
  0xb0   :  { %366 = vrcp.f32 %v497_v9  ;;  %v197_v22 = vmul.f32 %v196_v10, %v478_v41  ;;  %v186_v39 = vmul.f32 %v185_v24, %v478_v41  ;;  %vm166_vm2 = vweird.f32 %v160_v8 }
  0xb1   :  { %v277_v48 = vmul.f32 %v276_v40, %v481_v44  ;;  %v170_v58 = vand.u32 2147483647, %v160_v8  ;;  %v173_v0 = vor.u32 1.1754944e-38, %v172_v54  ;;  %v266_v1 = vmul.f32 %v265_v56, %v481_v44 }
  0xb2   :  { %v198_v28 = vadd.f32 0.4994258, %v197_v22  ;;  %v187_v51 = vadd.f32 0.18741608, %v186_v39  ;;  %v150_v2 = vmul.f32 %v149_v57, %v444_v15  ;;  %v252_v7 = vand.u32 2147483648, %v497_v9 }
  0xb3   :  { %v278_v52 = vadd.f32 0.4994258, %v277_v48  ;;  %vm171_vm4 = vcmp.eq.f32.partialorder %v170_v58, 8.507059e+37  ;;  %vm246_vm6 = vweird.f32 %v497_v9  ;;  %v267_v12 = vadd.f32 0.18741608, %v266_v1 }
  0xb4   :  { %v199_v37 = vmul.f32 %v198_v28, %v478_v41  ;;  %v188_v61 = vmul.f32 %v187_v51, %v478_v41  ;;  %v250_v41 = vand.u32 2147483647, %v497_v9  ;;  %v229_v21 = vadd.f32 1.1283791, %v228_v3 }
  0xb5   :  { %v365_v32 = vpop.eup %364  ;;  %v279_v59 = vmul.f32 %v278_v52, %v481_v44  ;;  %v253_v23 = vor.u32 1.1754944e-38, %v252_v7  ;;  %v268_v29 = vmul.f32 %v267_v12, %v481_v44  ;;  %v130_v44 = vmul.f32 0.5, %v439_v13 }
  0xb6   :  { %v507_v35 = vpop.eup %366  ;;  %v162_v36 = vmul.f32 %v365_v32, %v160_v8  ;;  %v200_v45 = vadd.f32 1.0, %v199_v37  ;;  %vm167_vm1 = vweird.f32 %v365_v32  ;;  %v189_v8 = vadd.f32 1.1283791, %v188_v61 }
  0xb7   :  { %v242_v38 = vmul.f32 %v507_v35, %v497_v9  ;;  %vm168_vm3 = vmor %vm166_vm2, %vm167_vm1  ;;  %v520_v62 = vadd.f32 1.0, %v279_v59  ;;  %vm247_vm5 = vweird.f32 %v507_v35  ;;  %vm251_vm9 = vcmp.eq.f32.partialorder %v250_v41, 8.507059e+37 }
  0xb8   :  { %v163_v42 = vsub.f32 1.0, %v162_v36  ;;  %368 = vrcp.f32 %v200_v45  ;;  %v210_v15 = vand.u32 2147483647, %v200_v45  ;;  %v212_v11 = vand.u32 2147483648, %v200_v45  ;;  %vm531_vm7 = vmor %vm246_vm6, %vm247_vm5 }
  0xb9   :  { %v243_v50 = vsub.f32 1.0, %v242_v38  ;;  %370 = vrcp.f32 %v520_v62  ;;  %vm206_vm10 = vweird.f32 %v200_v45  ;;  %v190_v26 = vmul.f32 %v189_v8, %v465_v31 }
  0xba   :  { %v164_v49 = vmul.f32 %v365_v32, %v163_v42  ;;  %vm211_vm12 = vcmp.eq.f32.partialorder %v210_v15, 8.507059e+37  ;;  %v213_v28 = vor.u32 1.1754944e-38, %v212_v11  ;;  %v230_v37 = vmul.f32 %v229_v21, %v447_v16 }
  0xbb   :  { %v244_v19 = vmul.f32 %v507_v35, %v243_v50  ;;  %v269_v42 = vadd.f32 1.1283791, %v268_v29  ;;  %v290_v43 = vand.u32 2147483647, %v520_v62  ;;  %v292_v31 = vand.u32 2147483648, %v520_v62 }
  0xbc   :  { %v165_v53 = vadd.f32 %v365_v32, %v164_v49  ;;  %v131_v48 = vmul.f32 0.5, %v459_v25  ;;  %vm286_vm14 = vweird.f32 %v520_v62  ;;  %v132_v25 = vmul.f32 0.5, %v441_v14 }
  0xbd   :  { %v245_v6 = vadd.f32 %v507_v35, %v244_v19  ;;  %v270_v51 = vmul.f32 %v269_v42, %v470_v34  ;;  %v293_v52 = vor.u32 1.1754944e-38, %v292_v31  ;;  %vm291_vm0 = vcmp.eq.f32.partialorder %v290_v43, 8.507059e+37 }
  0xbe   :  { %v169_v60 = vsel %vm168_vm3, %v365_v32, %v165_v53  ;;  %v369_v63 = vpop.eup %368  ;;  %v133_v19 = vmul.f32 0.5, %v462_v27 }
  0xbf   :  { %v202_v4 = vmul.f32 %v369_v63, %v200_v45  ;;  %v174_v5 = vsel %vm171_vm4, %v173_v0, %v169_v60  ;;  %vm207_vm8 = vweird.f32 %v369_v63  ;;  %v249_v22 = vsel %vm531_vm7, %v507_v35, %v245_v6  ;;  %v371_v9 = vpop.eup %370 }
  0xc0   :  { %v175_v20 = vmul.f32 %v174_v5, %v150_v2  ;;  %vm208_vm11 = vmor %vm206_vm10, %vm207_vm8  ;;  %v254_v32 = vsel %vm251_vm9, %v253_v23, %v249_v22  ;;  %v282_v36 = vmul.f32 %v371_v9, %v520_v62  ;;  %vm287_vm13 = vweird.f32 %v371_v9 }
  0xc1   :  { %v203_v10 = vsub.f32 1.0, %v202_v4  ;;  %v255_v40 = vmul.f32 %v254_v32, %v230_v37  ;;  %vm288_vm15 = vmor %vm286_vm14, %vm287_vm13 }
  0xc2   :  { %v337_v30 = vclamps-f32 %v175_v20, 1.0  ;;  %v283_v39 = vsub.f32 1.0, %v282_v36 }
  0xc3   :  { %v204_v18 = vmul.f32 %v369_v63, %v203_v10  ;;  %v339_v16 = vclamps-f32 %v255_v40, 1.0 }
  0xc4   :  { %v298_v45 = vadd.f32 1.0, %v337_v30  ;;  %v284_v47 = vmul.f32 %v371_v9, %v283_v39 }
  0xc5   :  { %v205_v24 = vadd.f32 %v369_v63, %v204_v18  ;;  %v300_v59 = vadd.f32 1.0, %v339_v16 }
  0xc6   :  { %v285_v50 = vadd.f32 %v371_v9, %v284_v47  ;;  %v302_v53 = vmul.f32 %v298_v45, %v130_v44 }
  0xc7   :  { %v209_v33 = vsel %vm208_vm11, %v369_v63, %v205_v24  ;;  %v304_v60 = vmul.f32 %v300_v59, %v132_v25 }
  0xc8   :  { %v214_v35 = vsel %vm211_vm12, %v213_v28, %v209_v33  ;;  %v289_v55 = vsel %vm288_vm15, %v371_v9, %v285_v50 }
  0xc9   :  { %v215_v38 = vmul.f32 %v214_v35, %v190_v26  ;;  %v294_v56 = vsel %vm291_vm0, %v293_v52, %v289_v55 }
  0xca   :  { %v295_v58 = vmul.f32 %v294_v56, %v270_v51 }
  0xcb   :  { %v338_v46 = vclamps-f32 %v215_v38, 1.0 }
  0xcc   :  { %v340_v13 = vclamps-f32 %v295_v58, 1.0 }
  0xcd   :  { %v299_v49 = vadd.f32 1.0, %v338_v46 }
  0xce   :  { %v301_v34 = vadd.f32 1.0, %v340_v13 }
  0xcf   :  { %v303_v54 = vmul.f32 %v299_v49, %v131_v48 }
  0xd0   :  { %v305_v61 = vmul.f32 %v301_v34, %v133_v19 }
  0xd1   :  { %v348_v57 = vpack.c.bf16 %v303_v54, %v302_v53 }
  0xd2   :  { %v353_v62 = vpack.c.bf16 %v305_v61, %v304_v60 }
  0xd3   :  { %349 = vst [vmem:[%s559_s3] sm:$0xff] %v348_v57  }
  0xd4   :  { %355 = vst [vmem:[%s559_s3 + $0x8] sm:$0xff] %v353_v62  }
  0xd5   :  { %318 = vsyncpa [#allocation4], 1 }

// kernel: entity_aware_layer.11
= control target key start
LH: loop header
LB: loop body
LE: loop exit
PB: predicated region body
PF: predicated region fallthrough
CT: control target
= control target key end

     0   :  { %vm27_vm0 = vcmask 523264   ;;  %v359_v2 = vmov 0.0   ;;  %v360_v44 = vmov 64.0   ;;  %s494_s1 = inlined_call_operand.vmem [shape: bf16[128,64], index: 1, kind: input, shape index: {}]   ;;  %s495_s0 = inlined_call_operand.vmem [shape: bf16[32,128], index: 0, kind: input, shape index: {}]   ;;  %s496_s2 = inlined_call_operand.vmem [shape: f32[1,64], index: 2, kind: input, shape index: {}]   ;;  %s497_s3 = inlined_call_operand.vmem [shape: f32[32,64], index: 3, kind: input, shape index: {}]   ;;  %s498_s4 = inlined_call_operand.vmem [shape: f32[1,64], index: 4, kind: input, shape index: {}]   ;;  %s499_s5 = inlined_call_operand.vmem [shape: f32[1,64], index: 5, kind: input, shape index: {}]   ;;  %s500_s6 = inlined_call_operand.vmem [shape: f32[32,64], index: 6, kind: output, shape index: {}]  }
   0x1   :  { %v335_v0 = vld [vmem:[%s494_s1 + $0x38] sm:$0xff]  ;;  %v334_v1 = vld [vmem:[%s494_s1 + $0x30] sm:$0xff]  ;;  %28 = vst.msk [vmem:[#allocation2] sm:$0xff] %vm27_vm0, %v359_v2  ;;  %v333_v3 = vld [vmem:[%s494_s1 + $0x28] sm:$0xff]  ;;  %349 = vrcp.f32 %v360_v44 }
   0x2   :  { %116 = vmatpush.bf16.msra.mxu0 %v335_v0  ;;  %336 = vmatpush.bf16.msra.mxu1 %v335_v0  ;;  %29 = vst.msk [vmem:[#allocation2 + $0x8] sm:$0xff] %vm27_vm0, %v359_v2  ;;  %v332_v4 = vld [vmem:[%s494_s1 + $0x20] sm:$0xff]  ;;  %v331_v5 = vld [vmem:[%s494_s1 + $0x18] sm:$0xff]  ;;  %v330_v6 = vld [vmem:[%s494_s1 + $0x10] sm:$0xff] }
   0x3   :  { %30 = vst.msk [vmem:[#allocation2 + $0x10] sm:$0xff] %vm27_vm0, %v359_v2  ;;  %v329_v7 = vld [vmem:[%s494_s1 + $0x8] sm:$0xff]  ;;  %v328_v8 = vld [vmem:[%s494_s1] sm:$0xff]  ;;  %v161_v27 = vld [vmem:[%s497_s3 + $0x10] sm:$0xff] }
   0x4   :  { %31 = vst.msk [vmem:[#allocation2 + $0x18] sm:$0xff] %vm27_vm0, %v359_v2  ;;  %v326_v9 = vld [vmem:[%s495_s0] sm:$0xff]  ;;  %v327_v10 = vld [vmem:[%s495_s0 + $0x8] sm:$0xff]  ;;  %v162_v37 = vld [vmem:[%s497_s3 + $0x18] sm:$0xff] }
   0x5   :  { %v346_v19 = vld [vmem:[%s496_s2] ss:$0 sm:$0xff]  ;;  %v160_v35 = vld [vmem:[%s497_s3 + $0x8] sm:$0xff] }
   0x6   :  { %117 = vmatpush.bf16.msra.mxu0 %v334_v1  ;;  %337 = vmatpush.bf16.msra.mxu1 %v334_v1  ;;  %v159_v25 = vld [vmem:[%s497_s3] sm:$0xff] }
   0x7   :  { %v350_v45 = vpop.eup %349 }
   0x8   :  { %v32_v11 = vld [vmem:[#allocation2] sm:$0xff]  ;;  %v180_v46 = vmul.f32 64.0, %v350_v45  ;;  %vm184_vm1 = vweird.f32 %v350_v45 }
   0x9   :  { %v33_v17 = vld [vmem:[#allocation2 + $0x8] sm:$0xff] }
   0xa   :  { %118 = vmatpush.bf16.msra.mxu0 %v333_v3  ;;  %338 = vmatpush.bf16.msra.mxu1 %v333_v3  ;;  %v34_v12 = vld [vmem:[#allocation2 + $0x10] sm:$0xff]  ;;  %v181_v47 = vsub.f32 1.0, %v180_v46 }
   0xb   :  { %v35_v18 = vld [vmem:[#allocation2 + $0x18] sm:$0xff] }
   0xc   :  { %v182_v48 = vmul.f32 %v350_v45, %v181_v47 }
   0xe   :  { %119 = vmatpush.bf16.msra.mxu0 %v332_v4  ;;  %339 = vmatpush.bf16.msra.mxu1 %v332_v4  ;;  %v183_v49 = vadd.f32 %v350_v45, %v182_v48 }
  0x10   :  { %v185_v50 = vsel %vm184_vm1, %v350_v45, %v183_v49 }
  0x12   :  { %120 = vmatpush.bf16.msra.mxu0 %v331_v5  ;;  %340 = vmatpush.bf16.msra.mxu1 %v331_v5 }
  0x16   :  { %121 = vmatpush.bf16.msra.mxu0 %v330_v6  ;;  %341 = vmatpush.bf16.msra.mxu1 %v330_v6 }
  0x1a   :  { %122 = vmatpush.bf16.msra.mxu0 %v329_v7  ;;  %342 = vmatpush.bf16.msra.mxu1 %v329_v7 }
  0x1e   :  { %123 = vmatpush.bf16.msra.mxu0 %v328_v8  ;;  %343 = vmatpush.bf16.msra.mxu1 %v328_v8 }
  0x21   :  { %124 = vmatmul.bf16.vlgmr.msra.gmra.mxu0 %v326_v9  ;;  %129 = vmatmul.bf16.vlgmr.msra.gmra.mxu1 %v327_v10 }
  0x9e   :  { %v125_v13 = vpop.f32.mrf.mxu0  ;;  %v130_v14 = vpop.f32.mrf.mxu1 }
  0x9f   :  { %v135_v15 = vadd.f32 %v125_v13, %v32_v11  ;;  %v137_v16 = vadd.f32 %v130_v14, %v34_v12 }
  0xa1   :  { %140 = vst.msk [vmem:[#allocation2] sm:$0xff] %vm27_vm0, %v135_v15 }
  0xa2   :  { %142 = vst.msk [vmem:[#allocation2 + $0x10] sm:$0xff] %vm27_vm0, %v137_v16 }
  0xa6   :  { %v127_v20 = vpop.f32.mrf.mxu0  ;;  %v132_v21 = vpop.f32.mrf.mxu1 }
  0xa7   :  { %v136_v22 = vadd.f32 %v127_v20, %v33_v17  ;;  %v138_v23 = vadd.f32 %v132_v21, %v35_v18 }
  0xa8   :  { %v147_v24 = vld [vmem:[#allocation2] sm:$0xff] }
  0xa9   :  { %141 = vst.msk [vmem:[#allocation2 + $0x8] sm:$0xff] %vm27_vm0, %v136_v22  ;;  %v149_v26 = vld [vmem:[#allocation2 + $0x10] sm:$0xff]  ;;  %v155_v28 = vadd.f32 %v346_v19, %v147_v24 }
  0xaa   :  { %143 = vst.msk [vmem:[#allocation2 + $0x18] sm:$0xff] %vm27_vm0, %v138_v23  ;;  %v157_v29 = vadd.f32 %v346_v19, %v149_v26 }
  0xab   :  { %v163_v30 = vadd.f32 %v159_v25, %v155_v28 }
  0xac   :  { %v165_v31 = vadd.f32 %v161_v27, %v157_v29 }
  0xad   :  { %v167_v32 = vsel %vm27_vm0, %v163_v30, 0.0 }
  0xae   :  { %v173_v33 = vsel %vm27_vm0, %v165_v31, 0.0  ;;  %168 = vadd.xlane.f32.xlu0 %v167_v32 }
  0xaf   :  { %174 = vadd.xlane.f32.xlu1 %v173_v33  ;;  %v347_v33 = vld [vmem:[%s498_s4] ss:$0 sm:$0xff] }
  0xb0   :  { %v148_v34 = vld [vmem:[#allocation2 + $0x8] sm:$0xff] }
  0xb1   :  { %v150_v36 = vld [vmem:[#allocation2 + $0x18] sm:$0xff]  ;;  %v156_v38 = vadd.f32 %v346_v19, %v148_v34 }
  0xb2   :  { %v158_v39 = vadd.f32 %v346_v19, %v150_v36 }
  0xb3   :  { %v164_v40 = vadd.f32 %v160_v35, %v156_v38  ;;  %v348_v38 = vld [vmem:[%s499_s5] ss:$0 sm:$0xff] }
  0xb4   :  { %v166_v41 = vadd.f32 %v162_v37, %v158_v39 }
  0xb5   :  { %v170_v42 = vsel %vm27_vm0, %v164_v40, 0.0 }
  0xb6   :  { %v176_v43 = vsel %vm27_vm0, %v166_v41, 0.0  ;;  %171 = vadd.xlane.f32.xlu0 %v170_v42 }
  0xb7   :  { %177 = vadd.xlane.f32.xlu1 %v176_v43 }
 0x121   :  { %v169_v51 = vpop.xlane.xlu0 %168 }
 0x122   :  { %v175_v52 = vpop.xlane.xlu1 %174  ;;  %v186_v53 = vmul.f32 %v185_v50, %v169_v51 }
 0x123   :  { %v188_v54 = vmul.f32 %v185_v50, %v175_v52 }
 0x124   :  { %v190_v55 = vsub.f32 %v163_v30, %v186_v53 }
 0x125   :  { %v453_v56 = vsub.f32 %v165_v31, %v188_v54 }
 0x126   :  { %v194_v57 = vmul.f32 %v190_v55, %v190_v55 }
 0x127   :  { %v196_v58 = vmul.f32 %v453_v56, %v453_v56 }
 0x128   :  { %v198_v59 = vsel %vm27_vm0, %v194_v57, 0.0 }
 0x129   :  { %199 = vadd.xlane.f32.xlu2 %v198_v59  ;;  %v204_v60 = vsel %vm27_vm0, %v196_v58, 0.0  ;;  %v172_v61 = vpop.xlane.xlu0 %171 }
 0x12a   :  { %v178_v62 = vpop.xlane.xlu1 %177  ;;  %205 = vadd.xlane.f32.xlu0 %v204_v60  ;;  %v187_v63 = vmul.f32 %v185_v50, %v172_v61 }
 0x12b   :  { %v189_v0 = vmul.f32 %v185_v50, %v178_v62 }
 0x12c   :  { %v459_v1 = vsub.f32 %v164_v40, %v187_v63 }
 0x12d   :  { %v461_v2 = vsub.f32 %v166_v41, %v189_v0 }
 0x12e   :  { %v195_v3 = vmul.f32 %v459_v1, %v459_v1 }
 0x12f   :  { %v197_v4 = vmul.f32 %v461_v2, %v461_v2 }
 0x130   :  { %v201_v5 = vsel %vm27_vm0, %v195_v3, 0.0 }
 0x131   :  { %v207_v6 = vsel %vm27_vm0, %v197_v4, 0.0  ;;  %202 = vadd.xlane.f32.xlu2 %v201_v5 }
 0x132   :  { %208 = vadd.xlane.f32.xlu1 %v207_v6 }
 0x19c   :  { %v200_v7 = vpop.xlane.xlu2 %199 }
 0x19d   :  { %v210_v8 = vmul.f32 %v200_v7, %v185_v50  ;;  %v206_v9 = vpop.xlane.xlu0 %205 }
 0x19e   :  { %v212_v10 = vmul.f32 %v206_v9, %v185_v50 }
 0x19f   :  { %v214_v11 = vadd.f32 1e-12, %v210_v8 }
 0x1a0   :  { %v216_v12 = vadd.f32 1e-12, %v212_v10 }
 0x1a1   :  { %351 = vrsqrt.f32 %v214_v11  ;;  %vm224_vm4 = vweird.f32 %v214_v11 }
 0x1a2   :  { %353 = vrsqrt.f32 %v216_v12  ;;  %vm244_vm6 = vweird.f32 %v216_v12 }
 0x1a4   :  { %v203_v13 = vpop.xlane.xlu2 %202 }
 0x1a5   :  { %v209_v14 = vpop.xlane.xlu1 %208  ;;  %v211_v15 = vmul.f32 %v203_v13, %v185_v50 }
 0x1a6   :  { %v213_v16 = vmul.f32 %v209_v14, %v185_v50 }
 0x1a7   :  { %v352_v17 = vpop.eup %351  ;;  %v215_v18 = vadd.f32 1e-12, %v211_v15 }
 0x1a8   :  { %v354_v19 = vpop.eup %353  ;;  %v219_v20 = vmul.f32 %v352_v17, %v214_v11  ;;  %v217_v21 = vadd.f32 1e-12, %v213_v16  ;;  %vm225_vm2 = vweird.f32 %v352_v17 }
 0x1a9   :  { %v239_v22 = vmul.f32 %v354_v19, %v216_v12  ;;  %355 = vrsqrt.f32 %v215_v18  ;;  %vm245_vm3 = vweird.f32 %v354_v19  ;;  %vm226_vm5 = vmor %vm224_vm4, %vm225_vm2  ;;  %vm234_vm10 = vweird.f32 %v215_v18 }
 0x1aa   :  { %v220_v23 = vmul.f32 %v352_v17, %v219_v20  ;;  %357 = vrsqrt.f32 %v217_v21  ;;  %vm246_vm7 = vmor %vm244_vm6, %vm245_vm3  ;;  %vm254_vm11 = vweird.f32 %v217_v21 }
 0x1ab   :  { %v240_v24 = vmul.f32 %v354_v19, %v239_v22 }
 0x1ac   :  { %v221_v25 = vmul.f32 0.5, %v220_v23 }
 0x1ad   :  { %v241_v26 = vmul.f32 0.5, %v240_v24 }
 0x1ae   :  { %v222_v27 = vsub.f32 1.5, %v221_v25 }
 0x1af   :  { %v356_v28 = vpop.eup %355  ;;  %v242_v29 = vsub.f32 1.5, %v241_v26 }
 0x1b0   :  { %v358_v30 = vpop.eup %357  ;;  %v223_v31 = vmul.f32 %v352_v17, %v222_v27  ;;  %v229_v32 = vmul.f32 %v356_v28, %v215_v18  ;;  %vm235_vm8 = vweird.f32 %v356_v28 }
 0x1b1   :  { %v243_v34 = vmul.f32 %v354_v19, %v242_v29  ;;  %v249_v35 = vmul.f32 %v358_v30, %v217_v21  ;;  %vm255_vm9 = vweird.f32 %v358_v30  ;;  %vm236_vm12 = vmor %vm234_vm10, %vm235_vm8 }
 0x1b2   :  { %v227_v36 = vsel %vm226_vm5, %v352_v17, %v223_v31  ;;  %v230_v37 = vmul.f32 %v356_v28, %v229_v32  ;;  %vm256_vm13 = vmor %vm254_vm11, %vm255_vm9 }
 0x1b3   :  { %v258_v39 = vmul.f32 %v227_v36, %v190_v55  ;;  %v247_v40 = vsel %vm246_vm7, %v354_v19, %v243_v34  ;;  %v250_v41 = vmul.f32 %v358_v30, %v249_v35 }
 0x1b4   :  { %v260_v42 = vmul.f32 %v247_v40, %v453_v56  ;;  %v231_v43 = vmul.f32 0.5, %v230_v37 }
 0x1b5   :  { %v266_v44 = vmul.f32 %v347_v33, %v258_v39  ;;  %v251_v45 = vmul.f32 0.5, %v250_v41 }
 0x1b6   :  { %v268_v46 = vmul.f32 %v347_v33, %v260_v42  ;;  %v232_v47 = vsub.f32 1.5, %v231_v43 }
 0x1b7   :  { %v274_v48 = vadd.f32 %v348_v38, %v266_v44  ;;  %v252_v49 = vsub.f32 1.5, %v251_v45 }
 0x1b8   :  { %v276_v50 = vadd.f32 %v348_v38, %v268_v46  ;;  %v233_v51 = vmul.f32 %v356_v28, %v232_v47 }
 0x1b9   :  { %278 = vst.msk [vmem:[%s500_s6] sm:$0xff] %vm27_vm0, %v274_v48  ;;  %v253_v52 = vmul.f32 %v358_v30, %v252_v49 }
 0x1ba   :  { %280 = vst.msk [vmem:[%s500_s6 + $0x10] sm:$0xff] %vm27_vm0, %v276_v50  ;;  %v237_v53 = vsel %vm236_vm12, %v356_v28, %v233_v51 }
 0x1bb   :  { %v257_v54 = vsel %vm256_vm13, %v358_v30, %v253_v52  ;;  %v259_v55 = vmul.f32 %v237_v53, %v459_v1 }
 0x1bc   :  { %v261_v56 = vmul.f32 %v257_v54, %v461_v2 }
 0x1bd   :  { %v267_v57 = vmul.f32 %v347_v33, %v259_v55 }
 0x1be   :  { %v269_v58 = vmul.f32 %v347_v33, %v261_v56 }
 0x1bf   :  { %v275_v59 = vadd.f32 %v348_v38, %v267_v57 }
 0x1c0   :  { %v277_v60 = vadd.f32 %v348_v38, %v269_v58 }
 0x1c1   :  { %279 = vst.msk [vmem:[%s500_s6 + $0x8] sm:$0xff] %vm27_vm0, %v275_v59 }
 0x1c2   :  { %281 = vst.msk [vmem:[%s500_s6 + $0x18] sm:$0xff] %vm27_vm0, %v277_v60 }

</bundles_post_ra>
